<compile_context>
chip_gen: v5e
topology: v5e:2x2
jax: 0.10.0
libtpu: 0.0.40
codegen_flags: <defaults>
</compile_context>

<pallas_src>
import functools

import jax
import jax.numpy as jnp
from jax.experimental import pallas as pl
from jax.experimental.pallas import tpu as pltpu

_BN_EPS = 1e-5
_LANE = 128


def _round_up(x, m):
    return (x + m - 1) // m * m


# ----------------------------------------------------------------------------
# Pallas kernels
# ----------------------------------------------------------------------------
def _mm_bn_kernel(a_ref, b_ref, s_ref, c_ref, o_ref, *, relu):
    """One (tm, tn) output tile of  opt_relu((A @ B) * scale + bias).

    A/B are bf16 (MXU native); accumulation is f32. The full K extent lives in a
    single block, so there is no reduction grid axis / accumulator scratch.
    """
    acc = jnp.dot(a_ref[...], b_ref[...], preferred_element_type=jnp.float32)
    y = acc * s_ref[...] + c_ref[...]
    if relu:
        y = jnp.maximum(y, 0.0)
    o_ref[...] = y.astype(o_ref.dtype)


def _mm_bn_res_kernel(a_ref, b_ref, s_ref, c_ref, r_ref, w_ref, o_ref, *, rezero):
    """conv2 matmul with BN + residual merge fused into the epilogue.

    rezero=True :  o = shortcut + res_weight * relu(acc * scale + bias)
    rezero=False:  o = relu(acc * scale + bias + shortcut)
    """
    acc = jnp.dot(a_ref[...], b_ref[...], preferred_element_type=jnp.float32)
    y = acc * s_ref[...] + c_ref[...]
    if rezero:
        o = r_ref[...] + w_ref[...] * jnp.maximum(y, 0.0)
    else:
        o = jnp.maximum(y + r_ref[...], 0.0)
    o_ref[...] = o.astype(o_ref.dtype)


def _mm_call(kernel_fn, a, w, s, c, extras, out_dtype):
    """Shared pallas_call wrapper: grid over (M tiles, N tiles), full K per block."""
    M, K = a.shape
    Kw, Np = w.shape
    assert K == Kw and Np % _LANE == 0
    tm = 128
    tn = _LANE
    Mp = _round_up(M, tm)
    if Mp != M:  # only pads when M is misaligned (never at the demo shapes)
        a = jnp.pad(a, ((0, Mp - M), (0, 0)))
        extras = [jnp.pad(e, ((0, Mp - M), (0, 0))) if e.shape[0] == M else e
                  for e in extras]

    in_specs = [
        pl.BlockSpec((tm, K), lambda i, j: (i, 0)),    # patches (bf16)
        pl.BlockSpec((K, tn), lambda i, j: (0, j)),    # weight  (bf16)
        pl.BlockSpec((1, tn), lambda i, j: (0, j)),    # BN scale
        pl.BlockSpec((1, tn), lambda i, j: (0, j)),    # BN bias
    ]
    for e in extras:
        if e.shape[0] == 1:                            # res_weight row vector
            in_specs.append(pl.BlockSpec((1, tn), lambda i, j: (0, j)))
        else:                                          # shortcut / residual tile
            in_specs.append(pl.BlockSpec((tm, tn), lambda i, j: (i, j)))

    out_bytes = Mp * Np * jnp.dtype(out_dtype).itemsize
    cost = pl.CostEstimate(
        flops=2 * Mp * K * Np,
        transcendentals=0,
        bytes_accessed=Mp * K * 2 + K * Np * 2 + out_bytes)

    out = pl.pallas_call(
        kernel_fn,
        out_shape=jax.ShapeDtypeStruct((Mp, Np), out_dtype),
        grid_spec=pltpu.PrefetchScalarGridSpec(
            num_scalar_prefetch=0,
            grid=(Mp // tm, Np // tn),
            in_specs=in_specs,
            out_specs=pl.BlockSpec((tm, tn), lambda i, j: (i, j)),
        ),
        compiler_params=pltpu.CompilerParams(
            dimension_semantics=("parallel", "parallel")),
        cost_estimate=cost,
    )(a, w, s, c, *extras)
    return out[:M] if Mp != M else out


def matmul_bn(a, wsc, *, relu, out_dtype):
    w, s, c = wsc
    return _mm_call(functools.partial(_mm_bn_kernel, relu=relu),
                    a, w, s, c, [], out_dtype)


def matmul_bn_residual(a, wsc, r, rw, *, rezero, out_dtype=jnp.float32):
    w, s, c = wsc
    return _mm_call(functools.partial(_mm_bn_res_kernel, rezero=rezero),
                    a, w, s, c, [r, rw], out_dtype)


# ----------------------------------------------------------------------------
# PHConv weight construction, BN folding, im2col glue (prep is hoisted out of
# the per-forward path; weights are pre-transposed, pre-padded and bf16)
# ----------------------------------------------------------------------------
def ph_weight(A, Fk):
    """A: (n,n,n), Fk: (n, out//n, in//n, kh, kw) -> OIHW weight (out, in, kh, kw)."""
    n = A.shape[0]
    W = jnp.einsum('sab,soikl->aobikl', A, Fk)
    return W.reshape(n * Fk.shape[1], n * Fk.shape[2], Fk.shape[3], Fk.shape[4])


def bn_fold(bn):
    # Inference-mode BatchNorm (running statistics), i.e. module.eval().
    # TODO(synk): training-mode batch-statistic BN not implemented.
    gamma, beta, mean, var = bn
    scale = gamma / jnp.sqrt(var + _BN_EPS)
    bias = beta - mean * scale
    return scale, bias


def prep_phconv_bn(conv_p, bn_p, cin_p, cout_p):
    """One-time prep: (kh*kw*Cin_p, Cout_p) bf16 matmul weight + folded BN affine."""
    w = ph_weight(*conv_p)                                   # (O, I, kh, kw)
    O, I, kh, kw = w.shape
    w_hwio = jnp.transpose(w, (2, 3, 1, 0))                  # (kh, kw, I, O)
    wp = jnp.zeros((kh, kw, cin_p, cout_p), jnp.float32).at[:, :, :I, :O].set(w_hwio)
    w2 = wp.reshape(kh * kw * cin_p, cout_p).astype(jnp.bfloat16)
    scale, bias = bn_fold(bn_p)
    s_p = jnp.zeros((1, cout_p), jnp.float32).at[0, :O].set(scale)
    c_p = jnp.zeros((1, cout_p), jnp.float32).at[0, :O].set(bias)
    return (w2, s_p, c_p)


def im2col_bf16(x, kh, kw, stride, pad):
    """Channel-padded NHWC activations -> bf16 patch matrix (M, kh*kw*C)."""
    # TODO(synk): fuse the kh*kw patch extraction into the Pallas matmul so the
    # expanded patch matrix is never materialized in HBM.
    N, H, W, C = x.shape
    xp = jnp.pad(x, ((0, 0), (pad, pad), (pad, pad), (0, 0))) if pad else x
    OH = (H + 2 * pad - kh) // stride + 1
    OW = (W + 2 * pad - kw) // stride + 1
    if kh == 1 and kw == 1:
        patches = xp[:, ::stride, ::stride, :]
    else:
        cols = [xp[:, i:i + stride * OH:stride, j:j + stride * OW:stride, :]
                for i in range(kh) for j in range(kw)]
        patches = jnp.stack(cols, axis=3)                     # (N, OH, OW, kh*kw, C)
    patches = patches.reshape(N * OH * OW, kh * kw * C).astype(jnp.bfloat16)
    return patches, (N, OH, OW)


def prep_basic_block(raw):
    cin, cout, stride = raw['in_planes'], raw['planes'], raw['stride']
    cin_p = _round_up(cin, _LANE)
    cout_p = _round_up(cout, _LANE)
    prep = {
        'stride': stride, 'rezero': raw['rezero'],
        'cin': cin, 'cout': cout, 'cin_p': cin_p, 'cout_p': cout_p,
        'conv1': prep_phconv_bn(raw['conv1'], raw['bn1'], cin_p, cout_p),
        'conv2': prep_phconv_bn(raw['conv2'], raw['bn2'], cout_p, cout_p),
    }
    if 'sc_conv' in raw:
        prep['sc'] = prep_phconv_bn(raw['sc_conv'], raw['sc_bn'], cin_p, cout_p)
    rw = raw['res_weight'] if raw['rezero'] else jnp.float32(1.0)
    prep['rw'] = jnp.full((1, cout_p), rw, jnp.float32)
    return prep


# ----------------------------------------------------------------------------
# BasicBlock forward (NCHW in / NCHW out, matching the PyTorch module)
# ----------------------------------------------------------------------------
def basic_block_forward(x_nchw, prep):
    stride = prep['stride']
    cin_p, cout_p, cout = prep['cin_p'], prep['cout_p'], prep['cout']
    N, C, H, W = x_nchw.shape
    x = jnp.transpose(x_nchw, (0, 2, 3, 1))                               # NHWC
    if cin_p != C:
        x = jnp.pad(x, ((0, 0), (0, 0), (0, 0), (0, cin_p - C)))          # lane-dense

    # conv1 -> bn1 -> relu  (kept bf16: it only feeds conv2's patches)
    a1, (nb, oh, ow) = im2col_bf16(x, 3, 3, stride, 1)
    h1 = matmul_bn(a1, prep['conv1'], relu=True, out_dtype=jnp.bfloat16)
    h1 = h1.reshape(nb, oh, ow, cout_p)

    # shortcut branch (f32), fed straight into conv2's fused epilogue
    if 'sc' in prep:
        a_sc, _ = im2col_bf16(x, 1, 1, stride, 0)
        r = matmul_bn(a_sc, prep['sc'], relu=False, out_dtype=jnp.float32)
    else:
        r = x.reshape(N * H * W, cin_p)

    # conv2 -> bn2 -> fused residual merge (rezero or plain relu(out + shortcut))
    a2, _ = im2col_bf16(h1, 3, 3, 1, 1)
    out = matmul_bn_residual(a2, prep['conv2'], r, prep['rw'],
                             rezero=prep['rezero'], out_dtype=jnp.float32)
    out = out.reshape(nb, oh, ow, cout_p)[:, :, :, :cout]
    return jnp.transpose(out, (0, 3, 1, 2))                               # NCHW


# ----------------------------------------------------------------------------
# Deterministic parameter init (shapes match BasicBlock.__init__)
# ----------------------------------------------------------------------------
def _xavier_uniform(key, shape, fan_in, fan_out):
    limit = (6.0 / (fan_in + fan_out)) ** 0.5
    return jax.random.uniform(key, shape, jnp.float32, -limit, limit)


def init_phconv(key, n, cin, cout, k):
    kA, kF = jax.random.split(key)
    A = _xavier_uniform(kA, (n, n, n), n, n)
    fi, fo = (cin // n) * k * k, (cout // n) * k * k
    Fk = _xavier_uniform(kF, (n, cout // n, cin // n, k, k), fi, fo)
    return (A, Fk)


def init_bn(key, c):
    k1, k2, k3, k4 = jax.random.split(key, 4)
    return (1.0 + 0.1 * jax.random.normal(k1, (c,), jnp.float32),
            0.1 * jax.random.normal(k2, (c,), jnp.float32),
            0.1 * jax.random.normal(k3, (c,), jnp.float32),
            1.0 + 0.1 * jax.random.uniform(k4, (c,), jnp.float32))


def init_basic_block(key, in_planes, planes, stride, n=4, rezero=True):
    keys = jax.random.split(key, 6)
    raw = {'in_planes': in_planes, 'planes': planes, 'stride': stride, 'rezero': rezero,
           'conv1': init_phconv(keys[0], n, in_planes, planes, 3),
           'bn1': init_bn(keys[1], planes),
           'conv2': init_phconv(keys[2], n, planes, planes, 3),
           'bn2': init_bn(keys[3], planes)}
    if stride != 1 or in_planes != planes:
        raw['sc_conv'] = init_phconv(keys[4], n, in_planes, planes, 1)
        raw['sc_bn'] = init_bn(keys[5], planes)
    if rezero:
        # PyTorch initializes res_weight to zero; use a nonzero value here so the
        # rezero branch actually contributes to the numerical check.
        raw['res_weight'] = jnp.float32(0.35)
    return raw


# ----------------------------------------------------------------------------
# Pure-JAX reference (independent conv path, bf16-rounded operands to match MXU)
# ----------------------------------------------------------------------------
def _ref_conv_bn(x, conv_p, bn_p, *, stride, pad):
    w = ph_weight(*conv_p)
    xb = x.astype(jnp.bfloat16).astype(jnp.float32)
    wb = w.astype(jnp.bfloat16).astype(jnp.float32)
    y = jax.lax.conv_general_dilated(
        xb, jnp.transpose(wb, (2, 3, 1, 0)),
        window_strides=(stride, stride),
        padding=[(pad, pad), (pad, pad)],
        dimension_numbers=('NHWC', 'HWIO', 'NHWC'),
        precision=jax.lax.Precision.HIGHEST)
    scale, bias = bn_fold(bn_p)
    return y * scale + bias


def ref_basic_block(x_nchw, raw):
    x = jnp.transpose(x_nchw, (0, 2, 3, 1))
    s = raw['stride']
    h = jnp.maximum(_ref_conv_bn(x, raw['conv1'], raw['bn1'], stride=s, pad=1), 0.0)
    y2 = _ref_conv_bn(h, raw['conv2'], raw['bn2'], stride=1, pad=1)
    sc = (_ref_conv_bn(x, raw['sc_conv'], raw['sc_bn'], stride=s, pad=0)
          if 'sc_conv' in raw else x)
    if raw['rezero']:
        out = sc + raw['res_weight'] * jnp.maximum(y2, 0.0)
    else:
        out = jnp.maximum(y2 + sc, 0.0)
    return jnp.transpose(out, (0, 3, 1, 2))


# ----------------------------------------------------------------------------
if __name__ == "__main__":
    key = jax.random.PRNGKey(0)
    k_p1, k_p2, k_x1, k_x2 = jax.random.split(key, 4)

    # Block 1: channel expansion + stride (PHConv 1x1 shortcut), rezero=True (module
    # default) -- same configuration as layer2's first block in PHCResNetLarge.
    raw1 = init_basic_block(k_p1, in_planes=60, planes=120, stride=2, n=4, rezero=True)
    x1 = jax.random.normal(k_x1, (2, 60, 16, 16), jnp.float32)

    # Block 2: identity shortcut with the plain relu(out + shortcut) merge.
    raw2 = init_basic_block(k_p2, in_planes=64, planes=64, stride=1, n=4, rezero=False)
    x2 = jax.random.normal(k_x2, (2, 64, 16, 16), jnp.float32)

    for name, raw, x in (("stride2_rezero", raw1, x1), ("identity_plain", raw2, x2)):
        prep = prep_basic_block(raw)        # weight/BN folding hoisted out of the forward
        fwd = jax.jit(functools.partial(basic_block_forward, prep=prep))
        y = fwd(x)
        jax.block_until_ready(y)
        y_ref = ref_basic_block(x, raw)
        err = float(jnp.max(jnp.abs(y - y_ref)))
        if not bool(jnp.allclose(y, y_ref, rtol=1e-2, atol=1e-2)):
            raise AssertionError(f"{name}: mismatch vs reference, max abs err = {err}")

    print("KERNEL_OK")
</pallas_src>

<mosaic_0001>
module attributes {stable_mosaic.version = 11 : i64} {
  func.func @_mm_bn_kernel(%arg0: i32, %arg1: i32, %arg2: memref<128x128xbf16, #tpu.memory_space<vmem>>, %arg3: memref<128x128xbf16, #tpu.memory_space<vmem>>, %arg4: memref<1x128xf32, #tpu.memory_space<vmem>>, %arg5: memref<1x128xf32, #tpu.memory_space<vmem>>, %arg6: memref<128x128xf32, #tpu.memory_space<vmem>>) attributes {dimension_semantics = [#tpu.dimension_semantics<parallel>, #tpu.dimension_semantics<parallel>], iteration_bounds = array<i64: 1, 1>, scalar_prefetch = 0 : i64, scratch_operands = 0 : i64, tpu.core_type = #tpu.core_type<tc>, window_params = [{transform_indices = @transform_0, window_bounds = array<i64: 128, 128>}, {transform_indices = @transform_1, window_bounds = array<i64: 128, 128>}, {transform_indices = @transform_2, window_bounds = array<i64: 1, 128>}, {transform_indices = @transform_3, window_bounds = array<i64: 1, 128>}, {transform_indices = @transform_4, window_bounds = array<i64: 128, 128>}]} {
    %c0 = arith.constant 0 : index
    %c0_0 = arith.constant 0 : index
    %0 = vector.load %arg2[%c0, %c0_0] : memref<128x128xbf16, #tpu.memory_space<vmem>>, vector<128x128xbf16>
    %c0_1 = arith.constant 0 : index
    %c0_2 = arith.constant 0 : index
    %1 = vector.load %arg3[%c0_1, %c0_2] : memref<128x128xbf16, #tpu.memory_space<vmem>>, vector<128x128xbf16>
    %cst = arith.constant dense<0.000000e+00> : vector<128x128xf32>
    %2 = tpu.matmul %0, %1, %cst {dimension_numbers = #tpu.dot_dimension_numbers<[1], [0], [0], [1], [0, 0, 1, 1], [], []>} : vector<128x128xbf16>, vector<128x128xbf16>, vector<128x128xf32> -> vector<128x128xf32>
    %c0_3 = arith.constant 0 : index
    %c0_4 = arith.constant 0 : index
    %3 = vector.load %arg4[%c0_3, %c0_4] : memref<1x128xf32, #tpu.memory_space<vmem>>, vector<1x128xf32>
    %4 = vector.broadcast %3 : vector<1x128xf32> to vector<128x128xf32>
    %5 = arith.mulf %2, %4 : vector<128x128xf32>
    %c0_5 = arith.constant 0 : index
    %c0_6 = arith.constant 0 : index
    %6 = vector.load %arg5[%c0_5, %c0_6] : memref<1x128xf32, #tpu.memory_space<vmem>>, vector<1x128xf32>
    %7 = vector.broadcast %6 : vector<1x128xf32> to vector<128x128xf32>
    %8 = arith.addf %5, %7 : vector<128x128xf32>
    %c0_7 = arith.constant 0 : index
    %c0_8 = arith.constant 0 : index
    %9 = vector.load %arg6[%c0_7, %c0_8] : memref<128x128xf32, #tpu.memory_space<vmem>>, vector<128x128xf32>
    tpu.vector_store %arg6[%c0_7, %c0_8], %8 {strides = array<i32>} : memref<128x128xf32, #tpu.memory_space<vmem>>, vector<128x128xf32>,
    return
  }
  func.func @transform_0(%arg0: i32, %arg1: i32) -> (i32, i32) {
    %c0_i32 = arith.constant 0 : i32
    %c0_i32_0 = arith.constant 0 : i32
    return %arg0, %c0_i32 : i32, i32
  }
  func.func @transform_1(%arg0: i32, %arg1: i32) -> (i32, i32) {
    %c0_i32 = arith.constant 0 : i32
    %c0_i32_0 = arith.constant 0 : i32
    return %c0_i32, %arg1 : i32, i32
  }
  func.func @transform_2(%arg0: i32, %arg1: i32) -> (i32, i32) {
    %c0_i32 = arith.constant 0 : i32
    %c0_i32_0 = arith.constant 0 : i32
    return %c0_i32, %arg1 : i32, i32
  }
  func.func @transform_3(%arg0: i32, %arg1: i32) -> (i32, i32) {
    %c0_i32 = arith.constant 0 : i32
    %c0_i32_0 = arith.constant 0 : i32
    return %c0_i32, %arg1 : i32, i32
  }
  func.func @transform_4(%arg0: i32, %arg1: i32) -> (i32, i32) {
    %c0_i32 = arith.constant 0 : i32
    return %arg0, %arg1 : i32, i32
  }
}

module attributes {stable_mosaic.version = 11 : i64} {
  func.func @_mm_bn_kernel(%arg0: i32, %arg1: i32, %arg2: memref<128x1152xbf16, #tpu.memory_space<vmem>>, %arg3: memref<1152x128xbf16, #tpu.memory_space<vmem>>, %arg4: memref<1x128xf32, #tpu.memory_space<vmem>>, %arg5: memref<1x128xf32, #tpu.memory_space<vmem>>, %arg6: memref<128x128xbf16, #tpu.memory_space<vmem>>) attributes {dimension_semantics = [#tpu.dimension_semantics<parallel>, #tpu.dimension_semantics<parallel>], iteration_bounds = array<i64: 1, 1>, scalar_prefetch = 0 : i64, scratch_operands = 0 : i64, tpu.core_type = #tpu.core_type<tc>, window_params = [{transform_indices = @transform_0, window_bounds = array<i64: 128, 1152>}, {transform_indices = @transform_1, window_bounds = array<i64: 1152, 128>}, {transform_indices = @transform_2, window_bounds = array<i64: 1, 128>}, {transform_indices = @transform_3, window_bounds = array<i64: 1, 128>}, {transform_indices = @transform_4, window_bounds = array<i64: 128, 128>}]} {
    %c0 = arith.constant 0 : index
    %c0_0 = arith.constant 0 : index
    %0 = vector.load %arg2[%c0, %c0_0] : memref<128x1152xbf16, #tpu.memory_space<vmem>>, vector<128x1152xbf16>
    %c0_1 = arith.constant 0 : index
    %c0_2 = arith.constant 0 : index
    %1 = vector.load %arg3[%c0_1, %c0_2] : memref<1152x128xbf16, #tpu.memory_space<vmem>>, vector<1152x128xbf16>
    %cst = arith.constant dense<0.000000e+00> : vector<128x128xf32>
    %2 = tpu.matmul %0, %1, %cst {dimension_numbers = #tpu.dot_dimension_numbers<[1], [0], [0], [1], [0, 0, 1, 1], [], []>} : vector<128x1152xbf16>, vector<1152x128xbf16>, vector<128x128xf32> -> vector<128x128xf32>
    %c0_3 = arith.constant 0 : index
    %c0_4 = arith.constant 0 : index
    %3 = vector.load %arg4[%c0_3, %c0_4] : memref<1x128xf32, #tpu.memory_space<vmem>>, vector<1x128xf32>
    %4 = vector.broadcast %3 : vector<1x128xf32> to vector<128x128xf32>
    %5 = arith.mulf %2, %4 : vector<128x128xf32>
    %c0_5 = arith.constant 0 : index
    %c0_6 = arith.constant 0 : index
    %6 = vector.load %arg5[%c0_5, %c0_6] : memref<1x128xf32, #tpu.memory_space<vmem>>, vector<1x128xf32>
    %7 = vector.broadcast %6 : vector<1x128xf32> to vector<128x128xf32>
    %8 = arith.addf %5, %7 : vector<128x128xf32>
    %cst_7 = arith.constant 0.000000e+00 : f32
    %9 = vector.broadcast %cst_7 : f32 to vector<128x128xf32>
    %10 = arith.maximumf %8, %9 : vector<128x128xf32>
    %11 = arith.truncf %10 : vector<128x128xf32> to vector<128x128xbf16>
    %c0_8 = arith.constant 0 : index
    %c0_9 = arith.constant 0 : index
    %12 = vector.load %arg6[%c0_8, %c0_9] : memref<128x128xbf16, #tpu.memory_space<vmem>>, vector<128x128xbf16>
    tpu.vector_store %arg6[%c0_8, %c0_9], %11 {strides = array<i32>} : memref<128x128xbf16, #tpu.memory_space<vmem>>, vector<128x128xbf16>,
    return
  }
  func.func @transform_0(%arg0: i32, %arg1: i32) -> (i32, i32) {
    %c0_i32 = arith.constant 0 : i32
    %c0_i32_0 = arith.constant 0 : i32
    return %arg0, %c0_i32 : i32, i32
  }
  func.func @transform_1(%arg0: i32, %arg1: i32) -> (i32, i32) {
    %c0_i32 = arith.constant 0 : i32
    %c0_i32_0 = arith.constant 0 : i32
    return %c0_i32, %arg1 : i32, i32
  }
  func.func @transform_2(%arg0: i32, %arg1: i32) -> (i32, i32) {
    %c0_i32 = arith.constant 0 : i32
    %c0_i32_0 = arith.constant 0 : i32
    return %c0_i32, %arg1 : i32, i32
  }
  func.func @transform_3(%arg0: i32, %arg1: i32) -> (i32, i32) {
    %c0_i32 = arith.constant 0 : i32
    %c0_i32_0 = arith.constant 0 : i32
    return %c0_i32, %arg1 : i32, i32
  }
  func.func @transform_4(%arg0: i32, %arg1: i32) -> (i32, i32) {
    %c0_i32 = arith.constant 0 : i32
    return %arg0, %arg1 : i32, i32
  }
}

module attributes {stable_mosaic.version = 11 : i64} {
  func.func @_mm_bn_res_kernel(%arg0: i32, %arg1: i32, %arg2: memref<128x1152xbf16, #tpu.memory_space<vmem>>, %arg3: memref<1152x128xbf16, #tpu.memory_space<vmem>>, %arg4: memref<1x128xf32, #tpu.memory_space<vmem>>, %arg5: memref<1x128xf32, #tpu.memory_space<vmem>>, %arg6: memref<128x128xf32, #tpu.memory_space<vmem>>, %arg7: memref<1x128xf32, #tpu.memory_space<vmem>>, %arg8: memref<128x128xf32, #tpu.memory_space<vmem>>) attributes {dimension_semantics = [#tpu.dimension_semantics<parallel>, #tpu.dimension_semantics<parallel>], iteration_bounds = array<i64: 1, 1>, scalar_prefetch = 0 : i64, scratch_operands = 0 : i64, tpu.core_type = #tpu.core_type<tc>, window_params = [{transform_indices = @transform_0, window_bounds = array<i64: 128, 1152>}, {transform_indices = @transform_1, window_bounds = array<i64: 1152, 128>}, {transform_indices = @transform_2, window_bounds = array<i64: 1, 128>}, {transform_indices = @transform_3, window_bounds = array<i64: 1, 128>}, {transform_indices = @transform_4, window_bounds = array<i64: 128, 128>}, {transform_indices = @transform_5, window_bounds = array<i64: 1, 128>}, {transform_indices = @transform_6, window_bounds = array<i64: 128, 128>}]} {
    %c0 = arith.constant 0 : index
    %c0_0 = arith.constant 0 : index
    %0 = vector.load %arg2[%c0, %c0_0] : memref<128x1152xbf16, #tpu.memory_space<vmem>>, vector<128x1152xbf16>
    %c0_1 = arith.constant 0 : index
    %c0_2 = arith.constant 0 : index
    %1 = vector.load %arg3[%c0_1, %c0_2] : memref<1152x128xbf16, #tpu.memory_space<vmem>>, vector<1152x128xbf16>
    %cst = arith.constant dense<0.000000e+00> : vector<128x128xf32>
    %2 = tpu.matmul %0, %1, %cst {dimension_numbers = #tpu.dot_dimension_numbers<[1], [0], [0], [1], [0, 0, 1, 1], [], []>} : vector<128x1152xbf16>, vector<1152x128xbf16>, vector<128x128xf32> -> vector<128x128xf32>
    %c0_3 = arith.constant 0 : index
    %c0_4 = arith.constant 0 : index
    %3 = vector.load %arg4[%c0_3, %c0_4] : memref<1x128xf32, #tpu.memory_space<vmem>>, vector<1x128xf32>
    %4 = vector.broadcast %3 : vector<1x128xf32> to vector<128x128xf32>
    %5 = arith.mulf %2, %4 : vector<128x128xf32>
    %c0_5 = arith.constant 0 : index
    %c0_6 = arith.constant 0 : index
    %6 = vector.load %arg5[%c0_5, %c0_6] : memref<1x128xf32, #tpu.memory_space<vmem>>, vector<1x128xf32>
    %7 = vector.broadcast %6 : vector<1x128xf32> to vector<128x128xf32>
    %8 = arith.addf %5, %7 : vector<128x128xf32>
    %c0_7 = arith.constant 0 : index
    %c0_8 = arith.constant 0 : index
    %9 = vector.load %arg6[%c0_7, %c0_8] : memref<128x128xf32, #tpu.memory_space<vmem>>, vector<128x128xf32>
    %c0_9 = arith.constant 0 : index
    %c0_10 = arith.constant 0 : index
    %10 = vector.load %arg7[%c0_9, %c0_10] : memref<1x128xf32, #tpu.memory_space<vmem>>, vector<1x128xf32>
    %cst_11 = arith.constant 0.000000e+00 : f32
    %11 = vector.broadcast %cst_11 : f32 to vector<128x128xf32>
    %12 = arith.maximumf %8, %11 : vector<128x128xf32>
    %13 = vector.broadcast %10 : vector<1x128xf32> to vector<128x128xf32>
    %14 = arith.mulf %13, %12 : vector<128x128xf32>
    %15 = arith.addf %9, %14 : vector<128x128xf32>
    %c0_12 = arith.constant 0 : index
    %c0_13 = arith.constant 0 : index
    %16 = vector.load %arg8[%c0_12, %c0_13] : memref<128x128xf32, #tpu.memory_space<vmem>>, vector<128x128xf32>
    tpu.vector_store %arg8[%c0_12, %c0_13], %15 {strides = array<i32>} : memref<128x128xf32, #tpu.memory_space<vmem>>, vector<128x128xf32>,
    return
  }
  func.func @transform_0(%arg0: i32, %arg1: i32) -> (i32, i32) {
    %c0_i32 = arith.constant 0 : i32
    %c0_i32_0 = arith.constant 0 : i32
    return %arg0, %c0_i32 : i32, i32
  }
  func.func @transform_1(%arg0: i32, %arg1: i32) -> (i32, i32) {
    %c0_i32 = arith.constant 0 : i32
    %c0_i32_0 = arith.constant 0 : i32
    return %c0_i32, %arg1 : i32, i32
  }
  func.func @transform_2(%arg0: i32, %arg1: i32) -> (i32, i32) {
    %c0_i32 = arith.constant 0 : i32
    %c0_i32_0 = arith.constant 0 : i32
    return %c0_i32, %arg1 : i32, i32
  }
  func.func @transform_3(%arg0: i32, %arg1: i32) -> (i32, i32) {
    %c0_i32 = arith.constant 0 : i32
    %c0_i32_0 = arith.constant 0 : i32
    return %c0_i32, %arg1 : i32, i32
  }
  func.func @transform_4(%arg0: i32, %arg1: i32) -> (i32, i32) {
    %c0_i32 = arith.constant 0 : i32
    return %arg0, %arg1 : i32, i32
  }
  func.func @transform_5(%arg0: i32, %arg1: i32) -> (i32, i32) {
    %c0_i32 = arith.constant 0 : i32
    %c0_i32_0 = arith.constant 0 : i32
    return %c0_i32, %arg1 : i32, i32
  }
  func.func @transform_6(%arg0: i32, %arg1: i32) -> (i32, i32) {
    %c0_i32 = arith.constant 0 : i32
    return %arg0, %arg1 : i32, i32
  }
}

</mosaic_0001>

<bundles_post_ra>
// kernel: basic_block_forward.4
= control target key start
LH: loop header
LB: loop body
LE: loop exit
PB: predicated region body
PF: predicated region fallthrough
CT: control target
= control target key end

     0   :  { %s505_s1 = inlined_call_operand.vmem [shape: bf16[128,128], index: 1, kind: input, shape index: {}]   ;;  %s506_s2 = inlined_call_operand.vmem [shape: f32[1,128], index: 2, kind: input, shape index: {}]   ;;  %s507_s3 = inlined_call_operand.vmem [shape: f32[1,128], index: 3, kind: input, shape index: {}]   ;;  %s508_s0 = inlined_call_operand.vmem [shape: bf16[128,128], index: 0, kind: input, shape index: {}]   ;;  %s509_s4 = inlined_call_operand.vmem [shape: f32[128,128], index: 4, kind: output, shape index: {}]  }
   0x1   :  { %v333_v0 = vld [vmem:[%s505_s1 + $0x38] sm:$0xff]  ;;  %v332_v1 = vld [vmem:[%s505_s1 + $0x30] sm:$0xff]  ;;  %v331_v2 = vld [vmem:[%s505_s1 + $0x28] sm:$0xff] }
   0x2   :  { %145 = vmatpush.bf16.msra.mxu0 %v333_v0  ;;  %334 = vmatpush.bf16.msra.mxu1 %v333_v0  ;;  %v330_v3 = vld [vmem:[%s505_s1 + $0x20] sm:$0xff]  ;;  %v329_v4 = vld [vmem:[%s505_s1 + $0x18] sm:$0xff]  ;;  %v328_v5 = vld [vmem:[%s505_s1 + $0x10] sm:$0xff] }
   0x3   :  { %335 = vmatpush.bf16.msra.mxu2 %v333_v0  ;;  %336 = vmatpush.bf16.msra.mxu3 %v333_v0  ;;  %v327_v6 = vld [vmem:[%s505_s1 + $0x8] sm:$0xff]  ;;  %v326_v7 = vld [vmem:[%s505_s1] sm:$0xff]  ;;  %v320_v9 = vld [vmem:[%s508_s0 + $0x10] sm:$0xff] }
   0x4   :  { %v318_v8 = vld [vmem:[%s508_s0] sm:$0xff]  ;;  %v324_v11 = vld [vmem:[%s508_s0 + $0x30] sm:$0xff]  ;;  %v319_v12 = vld [vmem:[%s508_s0 + $0x8] sm:$0xff] }
   0x5   :  { %v322_v10 = vld [vmem:[%s508_s0 + $0x20] sm:$0xff]  ;;  %v321_v13 = vld [vmem:[%s508_s0 + $0x18] sm:$0xff]  ;;  %v323_v14 = vld [vmem:[%s508_s0 + $0x28] sm:$0xff] }
   0x6   :  { %146 = vmatpush.bf16.msra.mxu0 %v332_v1  ;;  %337 = vmatpush.bf16.msra.mxu1 %v332_v1  ;;  %v325_v15 = vld [vmem:[%s508_s0 + $0x38] sm:$0xff]  ;;  %v358_v16 = vld [vmem:[%s506_s2] ss:$0 sm:$0xff] }
   0x7   :  { %338 = vmatpush.bf16.msra.mxu2 %v332_v1  ;;  %339 = vmatpush.bf16.msra.mxu3 %v332_v1  ;;  %v439_v17 = vld [vmem:[%s507_s3] ss:$0 sm:$0xff] }
   0xa   :  { %147 = vmatpush.bf16.msra.mxu0 %v331_v2  ;;  %340 = vmatpush.bf16.msra.mxu1 %v331_v2 }
   0xb   :  { %341 = vmatpush.bf16.msra.mxu2 %v331_v2  ;;  %342 = vmatpush.bf16.msra.mxu3 %v331_v2 }
   0xe   :  { %148 = vmatpush.bf16.msra.mxu0 %v330_v3  ;;  %343 = vmatpush.bf16.msra.mxu1 %v330_v3 }
   0xf   :  { %344 = vmatpush.bf16.msra.mxu2 %v330_v3  ;;  %345 = vmatpush.bf16.msra.mxu3 %v330_v3 }
  0x12   :  { %149 = vmatpush.bf16.msra.mxu0 %v329_v4  ;;  %346 = vmatpush.bf16.msra.mxu1 %v329_v4 }
  0x13   :  { %347 = vmatpush.bf16.msra.mxu2 %v329_v4  ;;  %348 = vmatpush.bf16.msra.mxu3 %v329_v4 }
  0x16   :  { %150 = vmatpush.bf16.msra.mxu0 %v328_v5  ;;  %349 = vmatpush.bf16.msra.mxu1 %v328_v5 }
  0x17   :  { %350 = vmatpush.bf16.msra.mxu2 %v328_v5  ;;  %351 = vmatpush.bf16.msra.mxu3 %v328_v5 }
  0x1a   :  { %151 = vmatpush.bf16.msra.mxu0 %v327_v6  ;;  %352 = vmatpush.bf16.msra.mxu1 %v327_v6 }
  0x1b   :  { %353 = vmatpush.bf16.msra.mxu2 %v327_v6  ;;  %354 = vmatpush.bf16.msra.mxu3 %v327_v6 }
  0x1e   :  { %152 = vmatpush.bf16.msra.mxu0 %v326_v7  ;;  %355 = vmatpush.bf16.msra.mxu1 %v326_v7 }
  0x1f   :  { %356 = vmatpush.bf16.msra.mxu2 %v326_v7  ;;  %357 = vmatpush.bf16.msra.mxu3 %v326_v7 }
  0x21   :  { %153 = vmatmul.bf16.vlgmr.msra.gmra.mxu0 %v318_v8  ;;  %163 = vmatmul.bf16.vlgmr.msra.gmra.mxu1 %v320_v9 }
  0x22   :  { %173 = vmatmul.bf16.vlgmr.msra.gmra.mxu2 %v322_v10  ;;  %183 = vmatmul.bf16.vlgmr.msra.gmra.mxu3 %v324_v11 }
  0x31   :  { %158 = vmatmul.bf16.gmra.mxu0 %v319_v12  ;;  %168 = vmatmul.bf16.gmra.mxu1 %v321_v13 }
  0x32   :  { %178 = vmatmul.bf16.gmra.mxu2 %v323_v14  ;;  %188 = vmatmul.bf16.gmra.mxu3 %v325_v15 }
  0x9e   :  { %v154_v18 = vpop.f32.mrf.mxu0  ;;  %v164_v19 = vpop.f32.mrf.mxu1 }
  0x9f   :  { %v198_v20 = vmul.f32 %v358_v16, %v154_v18  ;;  %v202_v21 = vmul.f32 %v358_v16, %v164_v19 }
  0xa1   :  { %v218_v22 = vadd.f32 %v439_v17, %v198_v20  ;;  %v222_v23 = vadd.f32 %v439_v17, %v202_v21 }
  0xa3   :  { %234 = vst [vmem:[%s509_s4] sm:$0xff] %v218_v22 }
  0xa4   :  { %238 = vst [vmem:[%s509_s4 + $0x20] sm:$0xff] %v222_v23 }
  0xa5   :  { %v174_v24 = vpop.f32.mrf.mxu2  ;;  %v184_v25 = vpop.f32.mrf.mxu3 }
  0xa6   :  { %v206_v26 = vmul.f32 %v358_v16, %v174_v24  ;;  %v210_v27 = vmul.f32 %v358_v16, %v184_v25  ;;  %v156_v28 = vpop.f32.mrf.mxu0  ;;  %v166_v29 = vpop.f32.mrf.mxu1 }
  0xa7   :  { %v199_v30 = vmul.f32 %v358_v16, %v156_v28  ;;  %v203_v31 = vmul.f32 %v358_v16, %v166_v29 }
  0xa8   :  { %v226_v32 = vadd.f32 %v439_v17, %v206_v26  ;;  %v230_v33 = vadd.f32 %v439_v17, %v210_v27 }
  0xa9   :  { %v219_v34 = vadd.f32 %v439_v17, %v199_v30  ;;  %v223_v35 = vadd.f32 %v439_v17, %v203_v31 }
  0xaa   :  { %242 = vst [vmem:[%s509_s4 + $0x40] sm:$0xff] %v226_v32 }
  0xab   :  { %246 = vst [vmem:[%s509_s4 + $0x60] sm:$0xff] %v230_v33 }
  0xac   :  { %235 = vst [vmem:[%s509_s4 + $0x8] sm:$0xff] %v219_v34 }
  0xad   :  { %239 = vst [vmem:[%s509_s4 + $0x28] sm:$0xff] %v223_v35  ;;  %v176_v36 = vpop.f32.mrf.mxu2  ;;  %v186_v37 = vpop.f32.mrf.mxu3 }
  0xae   :  { %v207_v38 = vmul.f32 %v358_v16, %v176_v36  ;;  %v211_v39 = vmul.f32 %v358_v16, %v186_v37  ;;  %v159_v40 = vpop.f32.mrf.mxu0  ;;  %v169_v41 = vpop.f32.mrf.mxu1 }
  0xaf   :  { %v200_v42 = vmul.f32 %v358_v16, %v159_v40  ;;  %v204_v43 = vmul.f32 %v358_v16, %v169_v41 }
  0xb0   :  { %v227_v44 = vadd.f32 %v439_v17, %v207_v38  ;;  %v231_v45 = vadd.f32 %v439_v17, %v211_v39 }
  0xb1   :  { %v220_v46 = vadd.f32 %v439_v17, %v200_v42  ;;  %v224_v47 = vadd.f32 %v439_v17, %v204_v43 }
  0xb2   :  { %243 = vst [vmem:[%s509_s4 + $0x48] sm:$0xff] %v227_v44 }
  0xb3   :  { %247 = vst [vmem:[%s509_s4 + $0x68] sm:$0xff] %v231_v45 }
  0xb4   :  { %236 = vst [vmem:[%s509_s4 + $0x10] sm:$0xff] %v220_v46 }
  0xb5   :  { %240 = vst [vmem:[%s509_s4 + $0x30] sm:$0xff] %v224_v47  ;;  %v179_v48 = vpop.f32.mrf.mxu2  ;;  %v189_v49 = vpop.f32.mrf.mxu3 }
  0xb6   :  { %v208_v50 = vmul.f32 %v358_v16, %v179_v48  ;;  %v212_v51 = vmul.f32 %v358_v16, %v189_v49  ;;  %v161_v52 = vpop.f32.mrf.mxu0  ;;  %v171_v53 = vpop.f32.mrf.mxu1 }
  0xb7   :  { %v201_v54 = vmul.f32 %v358_v16, %v161_v52  ;;  %v205_v55 = vmul.f32 %v358_v16, %v171_v53 }
  0xb8   :  { %v228_v56 = vadd.f32 %v439_v17, %v208_v50  ;;  %v232_v57 = vadd.f32 %v439_v17, %v212_v51 }
  0xb9   :  { %v221_v58 = vadd.f32 %v439_v17, %v201_v54  ;;  %v225_v59 = vadd.f32 %v439_v17, %v205_v55 }
  0xba   :  { %244 = vst [vmem:[%s509_s4 + $0x50] sm:$0xff] %v228_v56 }
  0xbb   :  { %248 = vst [vmem:[%s509_s4 + $0x70] sm:$0xff] %v232_v57 }
  0xbc   :  { %237 = vst [vmem:[%s509_s4 + $0x18] sm:$0xff] %v221_v58 }
  0xbd   :  { %241 = vst [vmem:[%s509_s4 + $0x38] sm:$0xff] %v225_v59  ;;  %v181_v60 = vpop.f32.mrf.mxu2  ;;  %v191_v61 = vpop.f32.mrf.mxu3 }
  0xbe   :  { %v209_v62 = vmul.f32 %v358_v16, %v181_v60  ;;  %v213_v63 = vmul.f32 %v358_v16, %v191_v61 }
  0xc0   :  { %v229_v0 = vadd.f32 %v439_v17, %v209_v62  ;;  %v233_v1 = vadd.f32 %v439_v17, %v213_v63 }
  0xc2   :  { %245 = vst [vmem:[%s509_s4 + $0x58] sm:$0xff] %v229_v0 }
  0xc3   :  { %249 = vst [vmem:[%s509_s4 + $0x78] sm:$0xff] %v233_v1 }

// kernel: basic_block_forward.3
= control target key start
LH: loop header
LB: loop body
LE: loop exit
PB: predicated region body
PF: predicated region fallthrough
CT: control target
= control target key end

     0   :  { %s3190_s1 = inlined_call_operand.vmem [shape: bf16[1152,128], index: 1, kind: input, shape index: {}]   ;;  %s3191_s0 = inlined_call_operand.vmem [shape: bf16[128,1152], index: 0, kind: input, shape index: {}]   ;;  %s3192_s2 = inlined_call_operand.vmem [shape: f32[1,128], index: 2, kind: input, shape index: {}]   ;;  %s3193_s3 = inlined_call_operand.vmem [shape: f32[1,128], index: 3, kind: input, shape index: {}]   ;;  %s3194_s4 = inlined_call_operand.vmem [shape: bf16[128,128], index: 4, kind: output, shape index: {}]  }
   0x1   :  { %v2229_v0 = vld [vmem:[%s3190_s1 + $0x38] sm:$0xff]  ;;  %v2228_v1 = vld [vmem:[%s3190_s1 + $0x30] sm:$0xff]  ;;  %v2227_v2 = vld [vmem:[%s3190_s1 + $0x28] sm:$0xff] }
   0x2   :  { %2341 = vmatpush.bf16.msra.mxu1 %v2229_v0  ;;  %2342 = vmatpush.bf16.msra.mxu2 %v2229_v0  ;;  %v2226_v3 = vld [vmem:[%s3190_s1 + $0x20] sm:$0xff]  ;;  %v2225_v4 = vld [vmem:[%s3190_s1 + $0x18] sm:$0xff]  ;;  %v2224_v5 = vld [vmem:[%s3190_s1 + $0x10] sm:$0xff] }
   0x3   :  { %2343 = vmatpush.bf16.msra.mxu3 %v2229_v0  ;;  %1041 = vmatpush.bf16.msra.mxu0 %v2229_v0  ;;  %v2223_v6 = vld [vmem:[%s3190_s1 + $0x8] sm:$0xff]  ;;  %v2222_v7 = vld [vmem:[%s3190_s1] sm:$0xff]  ;;  %v1648_v8 = vld [vmem:[%s3191_s0 + $0x90] sm:$0xf] }
   0x4   :  { %v2172_v9 = vld [vmem:[%s3191_s0 + $0xb0] sm:$0xf0]  ;;  %v1720_v10 = vld [vmem:[%s3191_s0 + $0x120] sm:$0xf]  ;;  %v2190_v11 = vld [vmem:[%s3191_s0 + $0x140] sm:$0xf0] }
   0x5   :  { %v1792_v12 = vld [vmem:[%s3191_s0 + $0x1b0] sm:$0xf]  ;;  %v2208_v13 = vld [vmem:[%s3191_s0 + $0x1d0] sm:$0xf0]  ;;  %v1576_v14 = vld [vmem:[%s3191_s0] sm:$0xf]  ;;  %v1649_v18 = vor.u32 %v2172_v9, %v1648_v8  ;;  %v1721_v19 = vor.u32 %v2190_v11, %v1720_v10 }
   0x6   :  { %2344 = vmatpush.bf16.msra.mxu1 %v2228_v1  ;;  %2345 = vmatpush.bf16.msra.mxu2 %v2228_v1  ;;  %v2154_v15 = vld [vmem:[%s3191_s0 + $0x20] sm:$0xf0]  ;;  %v2245_v16 = vld [vmem:[%s3190_s1 + $0xb8] sm:$0xff]  ;;  %v1793_v20 = vor.u32 %v2208_v13, %v1792_v12  ;;  %v2244_v24 = vld [vmem:[%s3190_s1 + $0xb0] sm:$0xff] }
   0x7   :  { %2346 = vmatpush.bf16.msra.mxu3 %v2228_v1  ;;  %1042 = vmatpush.bf16.msra.mxu0 %v2228_v1  ;;  %v2237_v17 = vld [vmem:[%s3190_s1 + $0x78] sm:$0xff]  ;;  %v1577_v21 = vor.u32 %v2154_v15, %v1576_v14  ;;  %v2236_v25 = vld [vmem:[%s3190_s1 + $0x70] sm:$0xff]  ;;  %v2243_v28 = vld [vmem:[%s3190_s1 + $0xa8] sm:$0xff] }
   0x8   :  { %v2253_v22 = vld [vmem:[%s3190_s1 + $0xf8] sm:$0xff]  ;;  %v2252_v26 = vld [vmem:[%s3190_s1 + $0xf0] sm:$0xff]  ;;  %v2235_v29 = vld [vmem:[%s3190_s1 + $0x68] sm:$0xff] }
   0x9   :  { %v2261_v23 = vld [vmem:[%s3190_s1 + $0x138] sm:$0xff]  ;;  %v2260_v27 = vld [vmem:[%s3190_s1 + $0x130] sm:$0xff]  ;;  %v2251_v30 = vld [vmem:[%s3190_s1 + $0xe8] sm:$0xff] }
   0xa   :  { %2347 = vmatpush.bf16.msra.mxu1 %v2227_v2  ;;  %2348 = vmatpush.bf16.msra.mxu2 %v2227_v2  ;;  %v2259_v31 = vld [vmem:[%s3190_s1 + $0x128] sm:$0xff]  ;;  %v2242_v32 = vld [vmem:[%s3190_s1 + $0xa0] sm:$0xff]  ;;  %v1684_v36 = vld [vmem:[%s3191_s0 + $0xd8] sm:$0xf] }
   0xb   :  { %2349 = vmatpush.bf16.msra.mxu3 %v2227_v2  ;;  %1043 = vmatpush.bf16.msra.mxu0 %v2227_v2  ;;  %v2234_v33 = vld [vmem:[%s3190_s1 + $0x60] sm:$0xff]  ;;  %v2181_v37 = vld [vmem:[%s3191_s0 + $0xf8] sm:$0xf0]  ;;  %v1756_v38 = vld [vmem:[%s3191_s0 + $0x168] sm:$0xf] }
   0xc   :  { %v2250_v34 = vld [vmem:[%s3190_s1 + $0xe0] sm:$0xff]  ;;  %v2199_v39 = vld [vmem:[%s3191_s0 + $0x188] sm:$0xf0]  ;;  %v1828_v40 = vld [vmem:[%s3191_s0 + $0x1f8] sm:$0xf]  ;;  %v1685_v46 = vor.u32 %v2181_v37, %v1684_v36 }
   0xd   :  { %v2258_v35 = vld [vmem:[%s3190_s1 + $0x120] sm:$0xff]  ;;  %v2217_v41 = vld [vmem:[%s3191_s0 + $0x218] sm:$0xf0]  ;;  %v1612_v42 = vld [vmem:[%s3191_s0 + $0x48] sm:$0xf]  ;;  %v1757_v47 = vor.u32 %v2199_v39, %v1756_v38 }
   0xe   :  { %2350 = vmatpush.bf16.msra.mxu1 %v2226_v3  ;;  %2351 = vmatpush.bf16.msra.mxu2 %v2226_v3  ;;  %v2163_v43 = vld [vmem:[%s3191_s0 + $0x68] sm:$0xf0]  ;;  %v2241_v44 = vld [vmem:[%s3190_s1 + $0x98] sm:$0xff]  ;;  %v1829_v48 = vor.u32 %v2217_v41, %v1828_v40  ;;  %v2240_v52 = vld [vmem:[%s3190_s1 + $0x90] sm:$0xff] }
   0xf   :  { %2352 = vmatpush.bf16.msra.mxu3 %v2226_v3  ;;  %1044 = vmatpush.bf16.msra.mxu0 %v2226_v3  ;;  %v2233_v45 = vld [vmem:[%s3190_s1 + $0x58] sm:$0xff]  ;;  %v1613_v49 = vor.u32 %v2163_v43, %v1612_v42  ;;  %v2232_v53 = vld [vmem:[%s3190_s1 + $0x50] sm:$0xff]  ;;  %v2239_v56 = vld [vmem:[%s3190_s1 + $0x88] sm:$0xff] }
  0x10   :  { %v2249_v50 = vld [vmem:[%s3190_s1 + $0xd8] sm:$0xff]  ;;  %v2248_v54 = vld [vmem:[%s3190_s1 + $0xd0] sm:$0xff]  ;;  %v2231_v57 = vld [vmem:[%s3190_s1 + $0x48] sm:$0xff] }
  0x11   :  { %v2257_v51 = vld [vmem:[%s3190_s1 + $0x118] sm:$0xff]  ;;  %v2256_v55 = vld [vmem:[%s3190_s1 + $0x110] sm:$0xff]  ;;  %v2247_v58 = vld [vmem:[%s3190_s1 + $0xc8] sm:$0xff] }
  0x12   :  { %2353 = vmatpush.bf16.msra.mxu1 %v2225_v4  ;;  %2354 = vmatpush.bf16.msra.mxu2 %v2225_v4  ;;  %v2255_v59 = vld [vmem:[%s3190_s1 + $0x108] sm:$0xff]  ;;  %v2238_v60 = vld [vmem:[%s3190_s1 + $0x80] sm:$0xff]  ;;  %v2277_v2 = vld [vmem:[%s3190_s1 + $0x1b8] sm:$0xff] }
  0x13   :  { %2355 = vmatpush.bf16.msra.mxu3 %v2225_v4  ;;  %1045 = vmatpush.bf16.msra.mxu0 %v2225_v4  ;;  %v2230_v61 = vld [vmem:[%s3190_s1 + $0x40] sm:$0xff]  ;;  %v1578_v1 = vld [vmem:[%s3191_s0 + $0x24] sm:$0xf0]  ;;  %v2269_v3 = vld [vmem:[%s3190_s1 + $0x178] sm:$0xff] }
  0x14   :  { %v2150_v62 = vld [vmem:[%s3191_s0 + $0x4] sm:$0xf]  ;;  %v1584_v4 = vld [vmem:[%s3191_s0 + $0x8] sm:$0xf]  ;;  %v1592_v8 = vld [vmem:[%s3191_s0 + $0x10] sm:$0xf] }
  0x15   :  { %v2246_v63 = vld [vmem:[%s3190_s1 + $0xc0] sm:$0xff]  ;;  %v2156_v9 = vld [vmem:[%s3191_s0 + $0x30] sm:$0xf0]  ;;  %v2285_v10 = vld [vmem:[%s3190_s1 + $0x1f8] sm:$0xff]  ;;  %v1581_v12 = vor.u32 %v2150_v62, %v1578_v1 }
  0x16   :  { %2356 = vmatpush.bf16.msra.mxu1 %v2224_v5  ;;  %2357 = vmatpush.bf16.msra.mxu2 %v2224_v5  ;;  %v2254_v0 = vld [vmem:[%s3190_s1 + $0x100] sm:$0xff]  ;;  %v2293_v11 = vld [vmem:[%s3190_s1 + $0x238] sm:$0xff]  ;;  %v1593_v15 = vor.u32 %v2156_v9, %v1592_v8  ;;  %v2168_v40 = vld [vmem:[%s3191_s0 + $0x94] sm:$0xf] }
  0x17   :  { %2358 = vmatpush.bf16.msra.mxu3 %v2224_v5  ;;  %1046 = vmatpush.bf16.msra.mxu0 %v2224_v5  ;;  %v2155_v5 = vld [vmem:[%s3191_s0 + $0x28] sm:$0xf0]  ;;  %v2274_v36 = vld [vmem:[%s3190_s1 + $0x1a0] sm:$0xff]  ;;  %v1650_v41 = vld [vmem:[%s3191_s0 + $0xb4] sm:$0xf0] }
  0x18   :  { %v1585_v13 = vor.u32 %v2155_v5, %v1584_v4  ;;  %v2282_v37 = vld [vmem:[%s3190_s1 + $0x1e0] sm:$0xff]  ;;  %v1656_v42 = vld [vmem:[%s3191_s0 + $0x98] sm:$0xf]  ;;  %v2173_v43 = vld [vmem:[%s3191_s0 + $0xb8] sm:$0xf0] }
  0x19   :  { %v2266_v38 = vld [vmem:[%s3190_s1 + $0x160] sm:$0xff]  ;;  %v1700_v62 = vld [vmem:[%s3191_s0 + $0xe8] sm:$0xf]  ;;  %v2272_v4 = vld [vmem:[%s3190_s1 + $0x190] sm:$0xff] }
  0x1a   :  { %2359 = vmatpush.bf16.msra.mxu1 %v2223_v6  ;;  %2360 = vmatpush.bf16.msra.mxu2 %v2223_v6  ;;  %v2290_v39 = vld [vmem:[%s3190_s1 + $0x220] sm:$0xff]  ;;  %v2280_v5 = vld [vmem:[%s3190_s1 + $0x1d0] sm:$0xff]  ;;  %v1722_v9 = vld [vmem:[%s3191_s0 + $0x144] sm:$0xf0] }
  0x1b   :  { %2361 = vmatpush.bf16.msra.mxu3 %v2223_v6  ;;  %1047 = vmatpush.bf16.msra.mxu0 %v2223_v6  ;;  %v2151_v6 = vld [vmem:[%s3191_s0 + $0xc] sm:$0xf]  ;;  %v2186_v8 = vld [vmem:[%s3191_s0 + $0x124] sm:$0xf] }
  0x1e   :  { %2362 = vmatpush.bf16.msra.mxu1 %v2222_v7  ;;  %2363 = vmatpush.bf16.msra.mxu2 %v2222_v7 }
  0x1f   :  { %2364 = vmatpush.bf16.msra.mxu3 %v2222_v7  ;;  %1048 = vmatpush.bf16.msra.mxu0 %v2222_v7  ;;  %v1586_v7 = vld [vmem:[%s3191_s0 + $0x2c] sm:$0xf0] }
  0x20   :  { %v1589_v14 = vor.u32 %v2151_v6, %v1586_v7  ;;  %v2264_v6 = vld [vmem:[%s3190_s1 + $0x150] sm:$0xff] }
  0x21   :  { %1059 = vmatmul.bf16.vlgmr.msra.gmra.mxu1 %v1649_v18  ;;  %1069 = vmatmul.bf16.vlgmr.msra.gmra.mxu2 %v1721_v19  ;;  %v2284_v18 = vld [vmem:[%s3190_s1 + $0x1f0] sm:$0xff] }
  0x22   :  { %1139 = vmatpush.bf16.msrb.mxu2 %v2245_v16  ;;  %1090 = vmatpush.bf16.msrb.mxu1 %v2237_v17  ;;  %v2276_v16 = vld [vmem:[%s3190_s1 + $0x1b0] sm:$0xff] }
  0x23   :  { %1079 = vmatmul.bf16.vlgmr.msra.gmra.mxu3 %v1793_v20  ;;  %1049 = vmatmul.bf16.vlgmr.msra.gmra.mxu0 %v1577_v21  ;;  %v2268_v17 = vld [vmem:[%s3190_s1 + $0x170] sm:$0xff]  ;;  %v2275_v20 = vld [vmem:[%s3190_s1 + $0x1a8] sm:$0xff] }
  0x24   :  { %1188 = vmatpush.bf16.msrb.mxu3 %v2253_v22  ;;  %1237 = vmatpush.bf16.msrb.mxu0 %v2261_v23  ;;  %v2292_v19 = vld [vmem:[%s3190_s1 + $0x230] sm:$0xff]  ;;  %v2267_v21 = vld [vmem:[%s3190_s1 + $0x168] sm:$0xff] }
  0x25   :  { %v2283_v22 = vld [vmem:[%s3190_s1 + $0x1e8] sm:$0xff]  ;;  %v2288_v7 = vld [vmem:[%s3190_s1 + $0x210] sm:$0xff] }
  0x26   :  { %1140 = vmatpush.bf16.msrb.mxu2 %v2244_v24  ;;  %1091 = vmatpush.bf16.msrb.mxu1 %v2236_v25  ;;  %v2291_v23 = vld [vmem:[%s3190_s1 + $0x228] sm:$0xff]  ;;  %v1614_v25 = vld [vmem:[%s3191_s0 + $0x6c] sm:$0xf0] }
  0x27   :  { %v2159_v24 = vld [vmem:[%s3191_s0 + $0x4c] sm:$0xf] }
  0x28   :  { %1189 = vmatpush.bf16.msrb.mxu3 %v2252_v26  ;;  %1238 = vmatpush.bf16.msrb.mxu0 %v2260_v27  ;;  %v1620_v26 = vld [vmem:[%s3191_s0 + $0x50] sm:$0xf]  ;;  %v2164_v27 = vld [vmem:[%s3191_s0 + $0x70] sm:$0xf0] }
  0x2a   :  { %1141 = vmatpush.bf16.msrb.mxu2 %v2243_v28  ;;  %1092 = vmatpush.bf16.msrb.mxu1 %v2235_v29  ;;  %v2160_v28 = vld [vmem:[%s3191_s0 + $0x54] sm:$0xf]  ;;  %v1622_v29 = vld [vmem:[%s3191_s0 + $0x74] sm:$0xf0] }
  0x2c   :  { %1190 = vmatpush.bf16.msrb.mxu3 %v2251_v30  ;;  %1239 = vmatpush.bf16.msrb.mxu0 %v2259_v31  ;;  %v1628_v30 = vld [vmem:[%s3191_s0 + $0x58] sm:$0xf]  ;;  %v2165_v31 = vld [vmem:[%s3191_s0 + $0x78] sm:$0xf0] }
  0x2e   :  { %1142 = vmatpush.bf16.msrb.mxu2 %v2242_v32  ;;  %1093 = vmatpush.bf16.msrb.mxu1 %v2234_v33  ;;  %v1617_v32 = vor.u32 %v2159_v24, %v1614_v25  ;;  %v1621_v33 = vor.u32 %v2164_v27, %v1620_v26  ;;  %v2195_v24 = vld [vmem:[%s3191_s0 + $0x16c] sm:$0xf]  ;;  %v1758_v25 = vld [vmem:[%s3191_s0 + $0x18c] sm:$0xf0]  ;;  %v2200_v27 = vld [vmem:[%s3191_s0 + $0x190] sm:$0xf0] }
  0x2f   :  { %v1764_v26 = vld [vmem:[%s3191_s0 + $0x170] sm:$0xf] }
  0x30   :  { %1191 = vmatpush.bf16.msrb.mxu3 %v2250_v34  ;;  %1240 = vmatpush.bf16.msrb.mxu0 %v2258_v35  ;;  %v1625_v34 = vor.u32 %v2160_v28, %v1622_v29  ;;  %v1629_v35 = vor.u32 %v2165_v31, %v1628_v30  ;;  %v2196_v28 = vld [vmem:[%s3191_s0 + $0x174] sm:$0xf]  ;;  %v1766_v29 = vld [vmem:[%s3191_s0 + $0x194] sm:$0xf0]  ;;  %v2201_v31 = vld [vmem:[%s3191_s0 + $0x198] sm:$0xf0] }
  0x31   :  { %1064 = vmatmul.bf16.gmra.mxu1 %v1685_v46  ;;  %1074 = vmatmul.bf16.gmra.mxu2 %v1757_v47  ;;  %v1664_v46 = vld [vmem:[%s3191_s0 + $0xa0] sm:$0xf]  ;;  %v2174_v47 = vld [vmem:[%s3191_s0 + $0xc0] sm:$0xf0]  ;;  %v1772_v30 = vld [vmem:[%s3191_s0 + $0x178] sm:$0xf] }
  0x32   :  { %1143 = vmatpush.bf16.msrb.mxu2 %v2241_v44  ;;  %1094 = vmatpush.bf16.msrb.mxu1 %v2233_v45  ;;  %v2169_v44 = vld [vmem:[%s3191_s0 + $0x9c] sm:$0xf]  ;;  %v1658_v45 = vld [vmem:[%s3191_s0 + $0xbc] sm:$0xf0] }
  0x33   :  { %1084 = vmatmul.bf16.gmra.mxu3 %v1829_v48  ;;  %1054 = vmatmul.bf16.gmra.mxu0 %v1613_v49  ;;  %v1653_v48 = vor.u32 %v2168_v40, %v1650_v41  ;;  %v1657_v49 = vor.u32 %v2173_v43, %v1656_v42  ;;  %v2204_v40 = vld [vmem:[%s3191_s0 + $0x1b4] sm:$0xf]  ;;  %v1794_v41 = vld [vmem:[%s3191_s0 + $0x1d4] sm:$0xf0]  ;;  %v2209_v43 = vld [vmem:[%s3191_s0 + $0x1d8] sm:$0xf0] }
  0x34   :  { %1192 = vmatpush.bf16.msrb.mxu3 %v2249_v50  ;;  %1241 = vmatpush.bf16.msrb.mxu0 %v2257_v51  ;;  %v1661_v50 = vor.u32 %v2169_v44, %v1658_v45  ;;  %v1665_v51 = vor.u32 %v2174_v47, %v1664_v46  ;;  %v1800_v42 = vld [vmem:[%s3191_s0 + $0x1b8] sm:$0xf]  ;;  %v2205_v44 = vld [vmem:[%s3191_s0 + $0x1bc] sm:$0xf]  ;;  %v1802_v45 = vld [vmem:[%s3191_s0 + $0x1dc] sm:$0xf0] }
  0x35   :  { %v1808_v46 = vld [vmem:[%s3191_s0 + $0x1c0] sm:$0xf]  ;;  %v2210_v47 = vld [vmem:[%s3191_s0 + $0x1e0] sm:$0xf0] }
  0x36   :  { %1144 = vmatpush.bf16.msrb.mxu2 %v2240_v52  ;;  %1095 = vmatpush.bf16.msrb.mxu1 %v2232_v53  ;;  %v2273_v52 = vld [vmem:[%s3190_s1 + $0x198] sm:$0xff] }
  0x37   :  { %v2281_v53 = vld [vmem:[%s3190_s1 + $0x1d8] sm:$0xff] }
  0x38   :  { %1193 = vmatpush.bf16.msrb.mxu3 %v2248_v54  ;;  %1242 = vmatpush.bf16.msrb.mxu0 %v2256_v55  ;;  %v2265_v54 = vld [vmem:[%s3190_s1 + $0x158] sm:$0xff] }
  0x39   :  { %v2289_v55 = vld [vmem:[%s3190_s1 + $0x218] sm:$0xff] }
  0x3a   :  { %1145 = vmatpush.bf16.msrb.mxu2 %v2239_v56  ;;  %1096 = vmatpush.bf16.msrb.mxu1 %v2231_v57  ;;  %v2177_v56 = vld [vmem:[%s3191_s0 + $0xdc] sm:$0xf]  ;;  %v1686_v57 = vld [vmem:[%s3191_s0 + $0xfc] sm:$0xf0] }
  0x3c   :  { %1194 = vmatpush.bf16.msrb.mxu3 %v2247_v58  ;;  %1243 = vmatpush.bf16.msrb.mxu0 %v2255_v59  ;;  %v1692_v58 = vld [vmem:[%s3191_s0 + $0xe0] sm:$0xf]  ;;  %v2182_v59 = vld [vmem:[%s3191_s0 + $0x100] sm:$0xf0] }
  0x3d   :  { %v1693_v1 = vor.u32 %v2182_v59, %v1692_v58  ;;  %v2213_v58 = vld [vmem:[%s3191_s0 + $0x1fc] sm:$0xf]  ;;  %v1830_v59 = vld [vmem:[%s3191_s0 + $0x21c] sm:$0xf0] }
  0x3e   :  { %1146 = vmatpush.bf16.msrb.mxu2 %v2238_v60  ;;  %1097 = vmatpush.bf16.msrb.mxu1 %v2230_v61  ;;  %v2178_v60 = vld [vmem:[%s3191_s0 + $0xe4] sm:$0xf]  ;;  %v1694_v61 = vld [vmem:[%s3191_s0 + $0x104] sm:$0xf0] }
  0x40   :  { %1195 = vmatpush.bf16.msrb.mxu3 %v2246_v63  ;;  %1244 = vmatpush.bf16.msrb.mxu0 %v2254_v0  ;;  %v2183_v63 = vld [vmem:[%s3191_s0 + $0x108] sm:$0xf0]  ;;  %v1689_v0 = vor.u32 %v2177_v56, %v1686_v57 }
  0x41   :  { %1098 = vmatmul.bf16.vlgmr.msrb.gmra.mxu1 %v1581_v12  ;;  %1147 = vmatmul.bf16.vlgmr.msrb.gmra.mxu2 %v1585_v13  ;;  %v2187_v12 = vld [vmem:[%s3191_s0 + $0x12c] sm:$0xf]  ;;  %v1730_v13 = vld [vmem:[%s3191_s0 + $0x14c] sm:$0xf0] }
  0x42   :  { %1335 = vmatpush.bf16.msra.mxu2 %v2277_v2  ;;  %1286 = vmatpush.bf16.msra.mxu1 %v2269_v3  ;;  %v1697_v2 = vor.u32 %v2178_v60, %v1694_v61  ;;  %v1701_v3 = vor.u32 %v2183_v63, %v1700_v62  ;;  %v1836_v60 = vld [vmem:[%s3191_s0 + $0x200] sm:$0xf]  ;;  %v2218_v61 = vld [vmem:[%s3191_s0 + $0x220] sm:$0xf0]  ;;  %v1838_v63 = vld [vmem:[%s3191_s0 + $0x224] sm:$0xf0] }
  0x43   :  { %1196 = vmatmul.bf16.vlgmr.msrb.gmra.mxu3 %v1589_v14  ;;  %1245 = vmatmul.bf16.vlgmr.msrb.gmra.mxu0 %v1593_v15  ;;  %v1736_v14 = vld [vmem:[%s3191_s0 + $0x130] sm:$0xf]  ;;  %v2192_v15 = vld [vmem:[%s3191_s0 + $0x150] sm:$0xf0]  ;;  %v2214_v62 = vld [vmem:[%s3191_s0 + $0x204] sm:$0xf] }
  0x44   :  { %1384 = vmatpush.bf16.msra.mxu3 %v2285_v10  ;;  %1433 = vmatpush.bf16.msra.mxu0 %v2293_v11  ;;  %v1728_v10 = vld [vmem:[%s3191_s0 + $0x128] sm:$0xf]  ;;  %v2191_v11 = vld [vmem:[%s3191_s0 + $0x148] sm:$0xf0] }
  0x46   :  { %1336 = vmatpush.bf16.msra.mxu2 %v2276_v16  ;;  %1287 = vmatpush.bf16.msra.mxu1 %v2268_v17  ;;  %v1725_v16 = vor.u32 %v2186_v8, %v1722_v9  ;;  %v1729_v17 = vor.u32 %v2191_v11, %v1728_v10 }
  0x48   :  { %1385 = vmatpush.bf16.msra.mxu3 %v2284_v18  ;;  %1434 = vmatpush.bf16.msra.mxu0 %v2292_v19  ;;  %v1733_v18 = vor.u32 %v2187_v12, %v1730_v13  ;;  %v1737_v19 = vor.u32 %v2192_v15, %v1736_v14  ;;  %v2152_v14 = vld [vmem:[%s3191_s0 + $0x14] sm:$0xf]  ;;  %v1594_v15 = vld [vmem:[%s3191_s0 + $0x34] sm:$0xf0] }
  0x4a   :  { %1337 = vmatpush.bf16.msra.mxu2 %v2275_v20  ;;  %1288 = vmatpush.bf16.msra.mxu1 %v2267_v21  ;;  %v2271_v20 = vld [vmem:[%s3190_s1 + $0x188] sm:$0xff] }
  0x4b   :  { %v2279_v21 = vld [vmem:[%s3190_s1 + $0x1c8] sm:$0xff] }
  0x4c   :  { %1386 = vmatpush.bf16.msra.mxu3 %v2283_v22  ;;  %1435 = vmatpush.bf16.msra.mxu0 %v2291_v23  ;;  %v2263_v22 = vld [vmem:[%s3190_s1 + $0x148] sm:$0xff] }
  0x4d   :  { %v2287_v23 = vld [vmem:[%s3190_s1 + $0x208] sm:$0xff] }
  0x4e   :  { %1338 = vmatpush.bf16.msra.mxu2 %v2274_v36  ;;  %1289 = vmatpush.bf16.msra.mxu1 %v2266_v38  ;;  %v2270_v36 = vld [vmem:[%s3190_s1 + $0x180] sm:$0xff] }
  0x4f   :  { %v2262_v38 = vld [vmem:[%s3190_s1 + $0x140] sm:$0xff] }
  0x50   :  { %1387 = vmatpush.bf16.msra.mxu3 %v2282_v37  ;;  %1436 = vmatpush.bf16.msra.mxu0 %v2290_v39  ;;  %v2278_v37 = vld [vmem:[%s3190_s1 + $0x1c0] sm:$0xff] }
  0x51   :  { %1103 = vmatmul.bf16.gmra.mxu1 %v1617_v32  ;;  %1152 = vmatmul.bf16.gmra.mxu2 %v1621_v33  ;;  %v1761_v32 = vor.u32 %v2195_v24, %v1758_v25  ;;  %v1765_v33 = vor.u32 %v2200_v27, %v1764_v26  ;;  %v2286_v39 = vld [vmem:[%s3190_s1 + $0x200] sm:$0xff]  ;;  %v1597_v24 = vor.u32 %v2152_v14, %v1594_v15 }
  0x52   :  { %1339 = vmatpush.bf16.msra.mxu2 %v2273_v52  ;;  %1290 = vmatpush.bf16.msra.mxu1 %v2265_v54  ;;  %v1809_v52 = vor.u32 %v2210_v47, %v1808_v46  ;;  %v2167_v46 = vld [vmem:[%s3191_s0 + $0x88] sm:$0xf0]  ;;  %v2170_v14 = vld [vmem:[%s3191_s0 + $0xa4] sm:$0xf] }
  0x53   :  { %1201 = vmatmul.bf16.gmra.mxu3 %v1625_v34  ;;  %1250 = vmatmul.bf16.gmra.mxu0 %v1629_v35  ;;  %v1769_v34 = vor.u32 %v2196_v28, %v1766_v29  ;;  %v1773_v35 = vor.u32 %v2201_v31, %v1772_v30 }
  0x54   :  { %1388 = vmatpush.bf16.msra.mxu3 %v2281_v53  ;;  %1437 = vmatpush.bf16.msra.mxu0 %v2289_v55 }
  0x56   :  { %1340 = vmatpush.bf16.msra.mxu2 %v2272_v4  ;;  %1291 = vmatpush.bf16.msra.mxu1 %v2264_v6  ;;  %v1833_v4 = vor.u32 %v2213_v58, %v1830_v59 }
  0x58   :  { %1389 = vmatpush.bf16.msra.mxu3 %v2280_v5  ;;  %1438 = vmatpush.bf16.msra.mxu0 %v2288_v7  ;;  %v1837_v5 = vor.u32 %v2218_v61, %v1836_v60  ;;  %v1841_v7 = vor.u32 %v2214_v62, %v1838_v63 }
  0x5a   :  { %1341 = vmatpush.bf16.msra.mxu2 %v2271_v20  ;;  %1292 = vmatpush.bf16.msra.mxu1 %v2263_v22  ;;  %v1608_v20 = vld [vmem:[%s3191_s0 + $0x20] sm:$0xf] }
  0x5c   :  { %1390 = vmatpush.bf16.msra.mxu3 %v2279_v21  ;;  %1439 = vmatpush.bf16.msra.mxu0 %v2287_v23  ;;  %v2158_v21 = vld [vmem:[%s3191_s0 + $0x40] sm:$0xf0] }
  0x5d   :  { %v1609_v28 = vor.u32 %v2158_v21, %v1608_v20  ;;  %v2176_v20 = vld [vmem:[%s3191_s0 + $0xd0] sm:$0xf0] }
  0x5e   :  { %1342 = vmatpush.bf16.msra.mxu2 %v2270_v36  ;;  %1293 = vmatpush.bf16.msra.mxu1 %v2262_v38  ;;  %v2161_v38 = vld [vmem:[%s3191_s0 + $0x5c] sm:$0xf] }
  0x60   :  { %1391 = vmatpush.bf16.msra.mxu3 %v2278_v37  ;;  %1440 = vmatpush.bf16.msra.mxu0 %v2286_v39  ;;  %v1630_v39 = vld [vmem:[%s3191_s0 + $0x7c] sm:$0xf0] }
  0x61   :  { %1108 = vmatmul.bf16.gmra.mxu1 %v1653_v48  ;;  %1157 = vmatmul.bf16.gmra.mxu2 %v1657_v49  ;;  %v1797_v48 = vor.u32 %v2204_v40, %v1794_v41  ;;  %v1801_v49 = vor.u32 %v2209_v43, %v1800_v42  ;;  %v1636_v41 = vld [vmem:[%s3191_s0 + $0x60] sm:$0xf]  ;;  %v2166_v42 = vld [vmem:[%s3191_s0 + $0x80] sm:$0xf0] }
  0x62   :  { %v2162_v43 = vld [vmem:[%s3191_s0 + $0x64] sm:$0xf] }
  0x63   :  { %1206 = vmatmul.bf16.gmra.mxu3 %v1661_v50  ;;  %1255 = vmatmul.bf16.gmra.mxu0 %v1665_v51  ;;  %v1805_v51 = vor.u32 %v2205_v44, %v1802_v45  ;;  %v1638_v44 = vld [vmem:[%s3191_s0 + $0x84] sm:$0xf0] }
  0x64   :  { %v1644_v45 = vld [vmem:[%s3191_s0 + $0x68] sm:$0xf] }
  0x65   :  { %v1645_v58 = vor.u32 %v2167_v46, %v1644_v45  ;;  %v1708_v45 = vld [vmem:[%s3191_s0 + $0xf0] sm:$0xf]  ;;  %v2184_v46 = vld [vmem:[%s3191_s0 + $0x110] sm:$0xf0] }
  0x71   :  { %1113 = vmatmul.bf16.gmra.mxu1 %v1689_v0  ;;  %1162 = vmatmul.bf16.gmra.mxu2 %v1693_v1  ;;  %v1844_v0 = vld [vmem:[%s3191_s0 + $0x208] sm:$0xf]  ;;  %v2219_v1 = vld [vmem:[%s3191_s0 + $0x228] sm:$0xf0] }
  0x72   :  { %v1845_v8 = vor.u32 %v2219_v1, %v1844_v0 }
  0x73   :  { %1211 = vmatmul.bf16.gmra.mxu3 %v1697_v2  ;;  %1260 = vmatmul.bf16.gmra.mxu0 %v1701_v3 }
  0x81   :  { %1118 = vmatmul.bf16.gmra.mxu1 %v1725_v16  ;;  %1167 = vmatmul.bf16.gmra.mxu2 %v1729_v17  ;;  %v1600_v16 = vld [vmem:[%s3191_s0 + $0x18] sm:$0xf]  ;;  %v2157_v17 = vld [vmem:[%s3191_s0 + $0x38] sm:$0xf0] }
  0x82   :  { %v1601_v25 = vor.u32 %v2157_v17, %v1600_v16  ;;  %v1672_v16 = vld [vmem:[%s3191_s0 + $0xa8] sm:$0xf]  ;;  %v2175_v17 = vld [vmem:[%s3191_s0 + $0xc8] sm:$0xf0] }
  0x83   :  { %1216 = vmatmul.bf16.gmra.mxu3 %v1733_v18  ;;  %1265 = vmatmul.bf16.gmra.mxu0 %v1737_v19  ;;  %v2153_v18 = vld [vmem:[%s3191_s0 + $0x1c] sm:$0xf]  ;;  %v1602_v19 = vld [vmem:[%s3191_s0 + $0x3c] sm:$0xf0] }
  0x84   :  { %v1605_v27 = vor.u32 %v2153_v18, %v1602_v19  ;;  %v1674_v18 = vld [vmem:[%s3191_s0 + $0xcc] sm:$0xf0] }
  0x85   :  { %v1680_v19 = vld [vmem:[%s3191_s0 + $0xb0] sm:$0xf] }
  0x91   :  { %1123 = vmatmul.bf16.gmra.mxu1 %v1761_v32  ;;  %1172 = vmatmul.bf16.gmra.mxu2 %v1765_v33 }
  0x93   :  { %1221 = vmatmul.bf16.gmra.mxu3 %v1769_v34  ;;  %1270 = vmatmul.bf16.gmra.mxu0 %v1773_v35 }
  0x9e   :  { %v2824_v50 = vpop.f32.mrf.mxu1 }
  0xa0   :  { %v1050_v53 = vpop.f32.mrf.mxu0 }
  0xa1   :  { %1128 = vmatmul.bf16.gmra.mxu1 %v1797_v48  ;;  %1177 = vmatmul.bf16.gmra.mxu2 %v1801_v49 }
  0xa3   :  { %1226 = vmatmul.bf16.gmra.mxu3 %v1805_v51  ;;  %1275 = vmatmul.bf16.gmra.mxu0 %v1809_v52  ;;  %v1633_v51 = vor.u32 %v2161_v38, %v1630_v39  ;;  %v1637_v52 = vor.u32 %v2166_v42, %v1636_v41 }
  0xa4   :  { %v2826_v54 = vpop.f32.mrf.mxu2 }
  0xa6   :  { %v2828_v55 = vpop.f32.mrf.mxu3  ;;  %v2830_v56 = vpop.f32.mrf.mxu1 }
  0xa8   :  { %v1052_v57 = vpop.f32.mrf.mxu0 }
  0xac   :  { %v2856_v2 = vpop.f32.mrf.mxu2 }
  0xae   :  { %v2858_v3 = vpop.f32.mrf.mxu3  ;;  %v2860_v6 = vpop.f32.mrf.mxu1 }
  0xb0   :  { %v1055_v9 = vpop.f32.mrf.mxu0 }
  0xb1   :  { %1133 = vmatmul.bf16.gmra.mxu1 %v1833_v4  ;;  %1182 = vmatmul.bf16.gmra.mxu2 %v1837_v5 }
  0xb3   :  { %1231 = vmatmul.bf16.gmra.mxu3 %v1841_v7  ;;  %1280 = vmatmul.bf16.gmra.mxu0 %v1845_v8 }
  0xb4   :  { %v2862_v10 = vpop.f32.mrf.mxu2 }
  0xb6   :  { %v2864_v11 = vpop.f32.mrf.mxu3  ;;  %v2866_v12 = vpop.f32.mrf.mxu1 }
  0xb8   :  { %v1057_v13 = vpop.f32.mrf.mxu0 }
  0xbc   :  { %v2892_v22 = vpop.f32.mrf.mxu2 }
  0xbe   :  { %v2894_v23 = vpop.f32.mrf.mxu3  ;;  %v1099_v26 = vpop.f32.mrf.mxu1 }
  0xbf   :  { %v1100_v29 = vadd.f32 %v1099_v26, %v1050_v53 }
  0xc0   :  { %v1246_v30 = vpop.f32.mrf.mxu0 }
  0xc1   :  { %1294 = vmatmul.bf16.vlgmr.msra.gmra.mxu1 %v1597_v24  ;;  %1343 = vmatmul.bf16.vlgmr.msra.gmra.mxu2 %v1601_v25 }
  0xc3   :  { %1392 = vmatmul.bf16.vlgmr.msra.gmra.mxu3 %v1605_v27  ;;  %1441 = vmatmul.bf16.vlgmr.msra.gmra.mxu0 %v1609_v28  ;;  %v1673_v27 = vor.u32 %v2175_v17, %v1672_v16 }
  0xc4   :  { %v1148_v31 = vpop.f32.mrf.mxu2 }
  0xc5   :  { %v1149_v32 = vadd.f32 %v1148_v31, %v1100_v29 }
  0xc6   :  { %v1197_v33 = vpop.f32.mrf.mxu3  ;;  %v1101_v34 = vpop.f32.mrf.mxu1 }
  0xc7   :  { %v1198_v35 = vadd.f32 %v1197_v33, %v1149_v32  ;;  %v1102_v36 = vadd.f32 %v1101_v34, %v1052_v57  ;;  %v1641_v57 = vor.u32 %v2162_v43, %v1638_v44  ;;  %v2179_v43 = vld [vmem:[%s3191_s0 + $0xec] sm:$0xf] }
  0xc8   :  { %v1248_v37 = vpop.f32.mrf.mxu0 }
  0xc9   :  { %v2902_v40 = vadd.f32 %v1246_v30, %v1198_v35  ;;  %v1681_v30 = vor.u32 %v2176_v20, %v1680_v19  ;;  %v1744_v19 = vld [vmem:[%s3191_s0 + $0x138] sm:$0xf]  ;;  %v2193_v20 = vld [vmem:[%s3191_s0 + $0x158] sm:$0xf0] }
  0xcc   :  { %v1150_v47 = vpop.f32.mrf.mxu2 }
  0xcd   :  { %v1151_v48 = vadd.f32 %v1150_v47, %v1102_v36  ;;  %v1710_v47 = vld [vmem:[%s3191_s0 + $0x114] sm:$0xf0] }
  0xce   :  { %v1199_v49 = vpop.f32.mrf.mxu3  ;;  %v1104_v53 = vpop.f32.mrf.mxu1 }
  0xcf   :  { %v1200_v59 = vadd.f32 %v1199_v49, %v1151_v48  ;;  %v1105_v60 = vadd.f32 %v1104_v53, %v1055_v9  ;;  %v1666_v9 = vld [vmem:[%s3191_s0 + $0xc4] sm:$0xf0]  ;;  %v1716_v48 = vld [vmem:[%s3191_s0 + $0xf8] sm:$0xf]  ;;  %v2185_v49 = vld [vmem:[%s3191_s0 + $0x118] sm:$0xf0] }
  0xd0   :  { %v1251_v61 = vpop.f32.mrf.mxu0  ;;  %v1669_v26 = vor.u32 %v2170_v14, %v1666_v9 }
  0xd1   :  { %1299 = vmatmul.bf16.gmra.mxu1 %v1633_v51  ;;  %1348 = vmatmul.bf16.gmra.mxu2 %v1637_v52  ;;  %v2922_v62 = vadd.f32 %v1248_v37, %v1200_v59 }
  0xd3   :  { %1397 = vmatmul.bf16.gmra.mxu3 %v1641_v57  ;;  %1446 = vmatmul.bf16.gmra.mxu0 %v1645_v58  ;;  %v1709_v58 = vor.u32 %v2184_v46, %v1708_v45  ;;  %v2197_v46 = vld [vmem:[%s3191_s0 + $0x17c] sm:$0xf] }
  0xd4   :  { %v1153_v63 = vpop.f32.mrf.mxu2 }
  0xd5   :  { %v1154_v0 = vadd.f32 %v1153_v63, %v1105_v60 }
  0xd6   :  { %v1202_v1 = vpop.f32.mrf.mxu3  ;;  %v1106_v4 = vpop.f32.mrf.mxu1 }
  0xd7   :  { %v1203_v5 = vadd.f32 %v1202_v1, %v1154_v0  ;;  %v1107_v7 = vadd.f32 %v1106_v4, %v1057_v13  ;;  %v2171_v13 = vld [vmem:[%s3191_s0 + $0xac] sm:$0xf] }
  0xd8   :  { %v1253_v8 = vpop.f32.mrf.mxu0  ;;  %v1677_v29 = vor.u32 %v2171_v13, %v1674_v18  ;;  %v2188_v13 = vld [vmem:[%s3191_s0 + $0x134] sm:$0xf] }
  0xd9   :  { %v2930_v15 = vadd.f32 %v1251_v61, %v1203_v5  ;;  %v1717_v61 = vor.u32 %v2185_v49, %v1716_v48  ;;  %v2202_v48 = vld [vmem:[%s3191_s0 + $0x1a0] sm:$0xf0] }
  0xda   :  { %v2198_v49 = vld [vmem:[%s3191_s0 + $0x184] sm:$0xf] }
  0xdc   :  { %v1155_v21 = vpop.f32.mrf.mxu2 }
  0xdd   :  { %v1156_v24 = vadd.f32 %v1155_v21, %v1107_v7  ;;  %v1746_v21 = vld [vmem:[%s3191_s0 + $0x15c] sm:$0xf0] }
  0xde   :  { %v1204_v25 = vpop.f32.mrf.mxu3  ;;  %v1109_v28 = vpop.f32.mrf.mxu1 }
  0xdf   :  { %v1205_v31 = vadd.f32 %v1204_v25, %v1156_v24  ;;  %v1110_v32 = vadd.f32 %v1109_v28, %v2824_v50  ;;  %v1702_v50 = vld [vmem:[%s3191_s0 + $0x10c] sm:$0xf0]  ;;  %v1752_v24 = vld [vmem:[%s3191_s0 + $0x140] sm:$0xf]  ;;  %v2194_v25 = vld [vmem:[%s3191_s0 + $0x160] sm:$0xf0] }
  0xe0   :  { %v1256_v33 = vpop.f32.mrf.mxu0  ;;  %v1705_v57 = vor.u32 %v2179_v43, %v1702_v50 }
  0xe1   :  { %1304 = vmatmul.bf16.gmra.mxu1 %v1669_v26  ;;  %1353 = vmatmul.bf16.gmra.mxu2 %v1673_v27  ;;  %v2951_v34 = vadd.f32 %v1253_v8, %v1205_v31 }
  0xe3   :  { %1402 = vmatmul.bf16.gmra.mxu3 %v1677_v29  ;;  %1451 = vmatmul.bf16.gmra.mxu0 %v1681_v30  ;;  %v1745_v30 = vor.u32 %v2193_v20, %v1744_v19  ;;  %v2206_v20 = vld [vmem:[%s3191_s0 + $0x1c4] sm:$0xf] }
  0xe4   :  { %v1158_v35 = vpop.f32.mrf.mxu2 }
  0xe5   :  { %v1159_v36 = vadd.f32 %v1158_v35, %v1110_v32 }
  0xe6   :  { %v1207_v37 = vpop.f32.mrf.mxu3  ;;  %v1111_v38 = vpop.f32.mrf.mxu1 }
  0xe7   :  { %v1208_v39 = vadd.f32 %v1207_v37, %v1159_v36  ;;  %v1112_v41 = vadd.f32 %v1111_v38, %v2830_v56  ;;  %v2180_v56 = vld [vmem:[%s3191_s0 + $0xf4] sm:$0xf] }
  0xe8   :  { %v1258_v42 = vpop.f32.mrf.mxu0  ;;  %v1713_v60 = vor.u32 %v2180_v56, %v1710_v47  ;;  %v1774_v56 = vld [vmem:[%s3191_s0 + $0x19c] sm:$0xf0] }
  0xe9   :  { %v2960_v44 = vadd.f32 %v1256_v33, %v1208_v39  ;;  %v1753_v33 = vor.u32 %v2194_v25, %v1752_v24  ;;  %v2211_v24 = vld [vmem:[%s3191_s0 + $0x1e8] sm:$0xf0] }
  0xea   :  { %v2207_v25 = vld [vmem:[%s3191_s0 + $0x1cc] sm:$0xf] }
  0xec   :  { %v1160_v51 = vpop.f32.mrf.mxu2 }
  0xed   :  { %v1161_v52 = vadd.f32 %v1160_v51, %v1112_v41 }
  0xee   :  { %v1209_v53 = vpop.f32.mrf.mxu3  ;;  %v1114_v59 = vpop.f32.mrf.mxu1 }
  0xef   :  { %v1210_v63 = vadd.f32 %v1209_v53, %v1161_v52  ;;  %v1115_v0 = vadd.f32 %v1114_v59, %v2860_v6  ;;  %v1738_v6 = vld [vmem:[%s3191_s0 + $0x154] sm:$0xf0]  ;;  %v1782_v52 = vld [vmem:[%s3191_s0 + $0x1a4] sm:$0xf0] }
  0xf0   :  { %v1261_v1 = vpop.f32.mrf.mxu0  ;;  %v1741_v29 = vor.u32 %v2188_v13, %v1738_v6  ;;  %v1788_v53 = vld [vmem:[%s3191_s0 + $0x188] sm:$0xf] }
  0xf1   :  { %1309 = vmatmul.bf16.gmra.mxu1 %v1705_v57  ;;  %1358 = vmatmul.bf16.gmra.mxu2 %v1709_v58  ;;  %v2981_v4 = vadd.f32 %v1258_v42, %v1210_v63  ;;  %v2203_v57 = vld [vmem:[%s3191_s0 + $0x1a8] sm:$0xf0] }
  0xf3   :  { %1407 = vmatmul.bf16.gmra.mxu3 %v1713_v60  ;;  %1456 = vmatmul.bf16.gmra.mxu0 %v1717_v61  ;;  %v1777_v61 = vor.u32 %v2197_v46, %v1774_v56 }
  0xf4   :  { %v1163_v5 = vpop.f32.mrf.mxu2 }
  0xf5   :  { %v1164_v7 = vadd.f32 %v1163_v5, %v1115_v0 }
  0xf6   :  { %v1212_v8 = vpop.f32.mrf.mxu3  ;;  %v1116_v14 = vpop.f32.mrf.mxu1 }
  0xf7   :  { %v1213_v9 = vadd.f32 %v1212_v8, %v1164_v7  ;;  %v1117_v16 = vadd.f32 %v1116_v14, %v2866_v12  ;;  %v2189_v12 = vld [vmem:[%s3191_s0 + $0x13c] sm:$0xf] }
  0xf8   :  { %v1263_v17 = vpop.f32.mrf.mxu0  ;;  %v1749_v32 = vor.u32 %v2189_v12, %v1746_v21  ;;  %v1810_v12 = vld [vmem:[%s3191_s0 + $0x1e4] sm:$0xf0] }
  0xf9   :  { %v2990_v18 = vadd.f32 %v1261_v1, %v1213_v9  ;;  %v1785_v1 = vor.u32 %v2198_v49, %v1782_v52  ;;  %v2215_v49 = vld [vmem:[%s3191_s0 + $0x20c] sm:$0xf] }
  0xfc   :  { %v1165_v26 = vpop.f32.mrf.mxu2 }
  0xfd   :  { %v1166_v27 = vadd.f32 %v1165_v26, %v1117_v16 }
  0xfe   :  { %v1214_v28 = vpop.f32.mrf.mxu3  ;;  %v1119_v31 = vpop.f32.mrf.mxu1 }
  0xff   :  { %v1215_v35 = vadd.f32 %v1214_v28, %v1166_v27  ;;  %v1120_v38 = vadd.f32 %v1119_v31, %v2826_v54  ;;  %v1780_v54 = vld [vmem:[%s3191_s0 + $0x180] sm:$0xf]  ;;  %v1818_v27 = vld [vmem:[%s3191_s0 + $0x1ec] sm:$0xf0] }
 0x100   :  { %v1266_v36 = vpop.f32.mrf.mxu0  ;;  %v1781_v63 = vor.u32 %v2202_v48, %v1780_v54  ;;  %v1824_v28 = vld [vmem:[%s3191_s0 + $0x1d0] sm:$0xf] }
 0x101   :  { %1314 = vmatmul.bf16.gmra.mxu1 %v1741_v29  ;;  %1363 = vmatmul.bf16.gmra.mxu2 %v1745_v30  ;;  %v3010_v37 = vadd.f32 %v1263_v17, %v1215_v35  ;;  %v2212_v29 = vld [vmem:[%s3191_s0 + $0x1f0] sm:$0xf0] }
 0x103   :  { %1412 = vmatmul.bf16.gmra.mxu3 %v1749_v32  ;;  %1461 = vmatmul.bf16.gmra.mxu0 %v1753_v33  ;;  %v1813_v33 = vor.u32 %v2206_v20, %v1810_v12 }
 0x104   :  { %v1168_v39 = vpop.f32.mrf.mxu2 }
 0x105   :  { %v1169_v41 = vadd.f32 %v1168_v39, %v1120_v38  ;;  %v1821_v38 = vor.u32 %v2207_v25, %v1818_v27 }
 0x106   :  { %v1217_v42 = vpop.f32.mrf.mxu3  ;;  %v1121_v43 = vpop.f32.mrf.mxu1 }
 0x107   :  { %v1218_v50 = vadd.f32 %v1217_v42, %v1169_v41  ;;  %v1122_v51 = vadd.f32 %v1121_v43, %v2856_v2  ;;  %v1789_v2 = vor.u32 %v2203_v57, %v1788_v53  ;;  %v2220_v53 = vld [vmem:[%s3191_s0 + $0x230] sm:$0xf0] }
 0x108   :  { %v1268_v45 = vpop.f32.mrf.mxu0  ;;  %v2216_v57 = vld [vmem:[%s3191_s0 + $0x214] sm:$0xf] }
 0x109   :  { %v3019_v47 = vadd.f32 %v1266_v36, %v1218_v50 }
 0x10c   :  { %v1170_v58 = vpop.f32.mrf.mxu2 }
 0x10d   :  { %v1171_v59 = vadd.f32 %v1170_v58, %v1122_v51  ;;  %v1846_v51 = vld [vmem:[%s3191_s0 + $0x22c] sm:$0xf0] }
 0x10e   :  { %v1219_v60 = vpop.f32.mrf.mxu3  ;;  %v1124_v0 = vpop.f32.mrf.mxu1 }
 0x10f   :  { %v1220_v5 = vadd.f32 %v1219_v60, %v1171_v59  ;;  %v1125_v14 = vadd.f32 %v1124_v0, %v2862_v10  ;;  %v1816_v10 = vld [vmem:[%s3191_s0 + $0x1c8] sm:$0xf]  ;;  %v1854_v59 = vld [vmem:[%s3191_s0 + $0x234] sm:$0xf0] }
 0x110   :  { %v1271_v7 = vpop.f32.mrf.mxu0  ;;  %v1817_v35 = vor.u32 %v2211_v24, %v1816_v10  ;;  %v1860_v60 = vld [vmem:[%s3191_s0 + $0x218] sm:$0xf] }
 0x111   :  { %1319 = vmatmul.bf16.gmra.mxu1 %v1777_v61  ;;  %1368 = vmatmul.bf16.gmra.mxu2 %v1781_v63  ;;  %v3040_v8 = vadd.f32 %v1268_v45, %v1220_v5  ;;  %v2221_v61 = vld [vmem:[%s3191_s0 + $0x238] sm:$0xf0] }
 0x113   :  { %1417 = vmatmul.bf16.gmra.mxu3 %v1785_v1  ;;  %1466 = vmatmul.bf16.gmra.mxu0 %v1789_v2  ;;  %v1849_v2 = vor.u32 %v2215_v49, %v1846_v51 }
 0x114   :  { %v1173_v9 = vpop.f32.mrf.mxu2 }
 0x115   :  { %v1174_v16 = vadd.f32 %v1173_v9, %v1125_v14  ;;  %v1857_v14 = vor.u32 %v2216_v57, %v1854_v59 }
 0x116   :  { %v1222_v17 = vpop.f32.mrf.mxu3  ;;  %v1126_v13 = vpop.f32.mrf.mxu1 }
 0x117   :  { %v1223_v6 = vadd.f32 %v1222_v17, %v1174_v16  ;;  %v1127_v26 = vadd.f32 %v1126_v13, %v2892_v22  ;;  %v1825_v22 = vor.u32 %v2212_v29, %v1824_v28 }
 0x118   :  { %v1273_v19 = vpop.f32.mrf.mxu0 }
 0x119   :  { %v3049_v21 = vadd.f32 %v1271_v7, %v1223_v6 }
 0x11c   :  { %v1175_v30 = vpop.f32.mrf.mxu2 }
 0x11d   :  { %v1176_v31 = vadd.f32 %v1175_v30, %v1127_v26 }
 0x11e   :  { %v1224_v32 = vpop.f32.mrf.mxu3  ;;  %v1129_v36 = vpop.f32.mrf.mxu1 }
 0x11f   :  { %v1225_v39 = vadd.f32 %v1224_v32, %v1176_v31  ;;  %v1130_v43 = vadd.f32 %v1129_v36, %v2828_v55  ;;  %v1852_v55 = vld [vmem:[%s3191_s0 + $0x210] sm:$0xf] }
 0x120   :  { %v1276_v41 = vpop.f32.mrf.mxu0  ;;  %v1853_v5 = vor.u32 %v2220_v53, %v1852_v55 }
 0x121   :  { %1324 = vmatmul.bf16.gmra.mxu1 %v1813_v33  ;;  %1373 = vmatmul.bf16.gmra.mxu2 %v1817_v35  ;;  %v3070_v42 = vadd.f32 %v1273_v19, %v1225_v39 }
 0x123   :  { %1422 = vmatmul.bf16.gmra.mxu3 %v1821_v38  ;;  %1471 = vmatmul.bf16.gmra.mxu0 %v1825_v22 }
 0x124   :  { %v1178_v50 = vpop.f32.mrf.mxu2 }
 0x125   :  { %v1179_v45 = vadd.f32 %v1178_v50, %v1130_v43 }
 0x126   :  { %v1227_v46 = vpop.f32.mrf.mxu3  ;;  %v1131_v56 = vpop.f32.mrf.mxu1 }
 0x127   :  { %v1228_v54 = vadd.f32 %v1227_v46, %v1179_v45  ;;  %v1132_v58 = vadd.f32 %v1131_v56, %v2858_v3  ;;  %v1861_v3 = vor.u32 %v2221_v61, %v1860_v60 }
 0x128   :  { %v1278_v48 = vpop.f32.mrf.mxu0 }
 0x129   :  { %v3079_v52 = vadd.f32 %v1276_v41, %v1228_v54 }
 0x12c   :  { %v1180_v63 = vpop.f32.mrf.mxu2 }
 0x12d   :  { %v1181_v0 = vadd.f32 %v1180_v63, %v1132_v58 }
 0x12e   :  { %v1229_v1 = vpop.f32.mrf.mxu3  ;;  %v1134_v7 = vpop.f32.mrf.mxu1 }
 0x12f   :  { %v1230_v9 = vadd.f32 %v1229_v1, %v1181_v0  ;;  %v1135_v13 = vadd.f32 %v1134_v7, %v2864_v11 }
 0x130   :  { %v1281_v16 = vpop.f32.mrf.mxu0 }
 0x131   :  { %1329 = vmatmul.bf16.gmra.mxu1 %v1849_v2  ;;  %1378 = vmatmul.bf16.gmra.mxu2 %v1853_v5  ;;  %v3100_v17 = vadd.f32 %v1278_v48, %v1230_v9  ;;  %v3119_v48 = vld [vmem:[%s3193_s3] ss:$0 sm:$0xff] }
 0x133   :  { %1427 = vmatmul.bf16.gmra.mxu3 %v1857_v14  ;;  %1476 = vmatmul.bf16.gmra.mxu0 %v1861_v3 }
 0x134   :  { %v1183_v6 = vpop.f32.mrf.mxu2 }
 0x135   :  { %v1184_v19 = vadd.f32 %v1183_v6, %v1135_v13 }
 0x136   :  { %v1232_v20 = vpop.f32.mrf.mxu3  ;;  %v1136_v12 = vpop.f32.mrf.mxu1 }
 0x137   :  { %v1233_v10 = vadd.f32 %v1232_v20, %v1184_v19  ;;  %v1137_v26 = vadd.f32 %v1136_v12, %v2894_v23  ;;  %v3112_v23 = vld [vmem:[%s3192_s2] ss:$0 sm:$0xff] }
 0x138   :  { %v1283_v24 = vpop.f32.mrf.mxu0 }
 0x139   :  { %v3103_v25 = vadd.f32 %v1281_v16, %v1233_v10 }
 0x13c   :  { %v1185_v27 = vpop.f32.mrf.mxu2 }
 0x13d   :  { %v1186_v28 = vadd.f32 %v1185_v27, %v1137_v26 }
 0x13e   :  { %v1234_v29 = vpop.f32.mrf.mxu3  ;;  %v1295_v30 = vpop.f32.mrf.mxu1 }
 0x13f   :  { %v1235_v31 = vadd.f32 %v1234_v29, %v1186_v28  ;;  %v1296_v11 = vadd.f32 %v1295_v30, %v2902_v40 }
 0x140   :  { %v1442_v32 = vpop.f32.mrf.mxu0 }
 0x141   :  { %v3106_v33 = vadd.f32 %v1283_v24, %v1235_v31 }
 0x144   :  { %v1344_v35 = vpop.f32.mrf.mxu2 }
 0x145   :  { %v1345_v36 = vadd.f32 %v1344_v35, %v1296_v11 }
 0x146   :  { %v1393_v38 = vpop.f32.mrf.mxu3  ;;  %v1297_v22 = vpop.f32.mrf.mxu1 }
 0x147   :  { %v1394_v39 = vadd.f32 %v1393_v38, %v1345_v36  ;;  %v1298_v50 = vadd.f32 %v1297_v22, %v2922_v62 }
 0x148   :  { %v1444_v41 = vpop.f32.mrf.mxu0 }
 0x149   :  { %v1443_v43 = vadd.f32 %v1442_v32, %v1394_v39 }
 0x14b   :  { %v1486_v40 = vmul.f32 %v3112_v23, %v1443_v43 }
 0x14c   :  { %v1346_v45 = vpop.f32.mrf.mxu2 }
 0x14d   :  { %v1347_v46 = vadd.f32 %v1346_v45, %v1298_v50  ;;  %v1506_v53 = vadd.f32 %v3119_v48, %v1486_v40 }
 0x14e   :  { %v1395_v56 = vpop.f32.mrf.mxu3  ;;  %v1300_v54 = vpop.f32.mrf.mxu1 }
 0x14f   :  { %v1396_v49 = vadd.f32 %v1395_v56, %v1347_v46  ;;  %v1301_v62 = vadd.f32 %v1300_v54, %v2930_v15  ;;  %v1522_v0 = vmax.f32 %v1506_v53, 0.0 }
 0x150   :  { %v1447_v51 = vpop.f32.mrf.mxu0 }
 0x151   :  { %v1445_v55 = vadd.f32 %v1444_v41, %v1396_v49 }
 0x153   :  { %v1487_v57 = vmul.f32 %v3112_v23, %v1445_v55 }
 0x154   :  { %v1349_v58 = vpop.f32.mrf.mxu2 }
 0x155   :  { %v1507_v59 = vadd.f32 %v3119_v48, %v1487_v57  ;;  %v1350_v60 = vadd.f32 %v1349_v58, %v1301_v62 }
 0x156   :  { %v1398_v61 = vpop.f32.mrf.mxu3  ;;  %v1302_v63 = vpop.f32.mrf.mxu1 }
 0x157   :  { %v1523_v1 = vmax.f32 %v1507_v59, 0.0  ;;  %v1399_v2 = vadd.f32 %v1398_v61, %v1350_v60  ;;  %v1303_v3 = vadd.f32 %v1302_v63, %v2951_v34 }
 0x158   :  { %v1449_v5 = vpop.f32.mrf.mxu0 }
 0x159   :  { %v2297_v7 = vpack.c.bf16 %v1523_v1, %v1522_v0  ;;  %v1448_v14 = vadd.f32 %v1447_v51, %v1399_v2 }
 0x15b   :  { %2298 = vst [vmem:[%s3194_s4] sm:$0xff] %v2297_v7   ;;  %v1488_v6 = vmul.f32 %v3112_v23, %v1448_v14 }
 0x15c   :  { %v1351_v9 = vpop.f32.mrf.mxu2 }
 0x15d   :  { %v1352_v15 = vadd.f32 %v1351_v9, %v1303_v3  ;;  %v1508_v10 = vadd.f32 %v3119_v48, %v1488_v6 }
 0x15e   :  { %v1400_v16 = vpop.f32.mrf.mxu3  ;;  %v1305_v13 = vpop.f32.mrf.mxu1 }
 0x15f   :  { %v1401_v19 = vadd.f32 %v1400_v16, %v1352_v15  ;;  %v1306_v26 = vadd.f32 %v1305_v13, %v2960_v44  ;;  %v1524_v31 = vmax.f32 %v1508_v10, 0.0 }
 0x160   :  { %v1452_v20 = vpop.f32.mrf.mxu0 }
 0x161   :  { %v1450_v12 = vadd.f32 %v1449_v5, %v1401_v19 }
 0x163   :  { %v1489_v24 = vmul.f32 %v3112_v23, %v1450_v12 }
 0x164   :  { %v1354_v27 = vpop.f32.mrf.mxu2 }
 0x165   :  { %v1509_v28 = vadd.f32 %v3119_v48, %v1489_v24  ;;  %v1355_v29 = vadd.f32 %v1354_v27, %v1306_v26 }
 0x166   :  { %v1403_v34 = vpop.f32.mrf.mxu3  ;;  %v1307_v30 = vpop.f32.mrf.mxu1 }
 0x167   :  { %v1525_v32 = vmax.f32 %v1509_v28, 0.0  ;;  %v1404_v11 = vadd.f32 %v1403_v34, %v1355_v29  ;;  %v1308_v22 = vadd.f32 %v1307_v30, %v2981_v4 }
 0x168   :  { %v1454_v35 = vpop.f32.mrf.mxu0 }
 0x169   :  { %v2302_v36 = vpack.c.bf16 %v1525_v32, %v1524_v31  ;;  %v1453_v38 = vadd.f32 %v1452_v20, %v1404_v11 }
 0x16b   :  { %2334 = vst [vmem:[%s3194_s4 + $0x8] sm:$0xff] %v2302_v36   ;;  %v1490_v50 = vmul.f32 %v3112_v23, %v1453_v38 }
 0x16c   :  { %v1356_v39 = vpop.f32.mrf.mxu2 }
 0x16d   :  { %v1357_v44 = vadd.f32 %v1356_v39, %v1308_v22  ;;  %v1510_v54 = vadd.f32 %v3119_v48, %v1490_v50 }
 0x16e   :  { %v1405_v41 = vpop.f32.mrf.mxu3  ;;  %v1310_v43 = vpop.f32.mrf.mxu1 }
 0x16f   :  { %v1406_v45 = vadd.f32 %v1405_v41, %v1357_v44  ;;  %v1311_v49 = vadd.f32 %v1310_v43, %v2990_v18  ;;  %v1526_v62 = vmax.f32 %v1510_v54, 0.0 }
 0x170   :  { %v1457_v46 = vpop.f32.mrf.mxu0 }
 0x171   :  { %v1455_v56 = vadd.f32 %v1454_v35, %v1406_v45 }
 0x173   :  { %v1491_v40 = vmul.f32 %v3112_v23, %v1455_v56 }
 0x174   :  { %v1359_v51 = vpop.f32.mrf.mxu2 }
 0x175   :  { %v1511_v55 = vadd.f32 %v3119_v48, %v1491_v40  ;;  %v1360_v53 = vadd.f32 %v1359_v51, %v1311_v49 }
 0x176   :  { %v1408_v4 = vpop.f32.mrf.mxu3  ;;  %v1312_v57 = vpop.f32.mrf.mxu1 }
 0x177   :  { %v1527_v58 = vmax.f32 %v1511_v55, 0.0  ;;  %v1409_v59 = vadd.f32 %v1408_v4, %v1360_v53  ;;  %v1313_v0 = vadd.f32 %v1312_v57, %v3010_v37 }
 0x178   :  { %v1459_v60 = vpop.f32.mrf.mxu0 }
 0x179   :  { %v2307_v61 = vpack.c.bf16 %v1527_v58, %v1526_v62  ;;  %v1458_v63 = vadd.f32 %v1457_v46, %v1409_v59 }
 0x17b   :  { %2335 = vst [vmem:[%s3194_s4 + $0x10] sm:$0xff] %v2307_v61   ;;  %v1492_v7 = vmul.f32 %v3112_v23, %v1458_v63 }
 0x17c   :  { %v1361_v1 = vpop.f32.mrf.mxu2 }
 0x17d   :  { %v1362_v18 = vadd.f32 %v1361_v1, %v1313_v0  ;;  %v1512_v15 = vadd.f32 %v3119_v48, %v1492_v7 }
 0x17e   :  { %v1410_v2 = vpop.f32.mrf.mxu3  ;;  %v1315_v5 = vpop.f32.mrf.mxu1 }
 0x17f   :  { %v1411_v14 = vadd.f32 %v1410_v2, %v1362_v18  ;;  %v1316_v13 = vadd.f32 %v1315_v5, %v3019_v47  ;;  %v1528_v10 = vmax.f32 %v1512_v15, 0.0 }
 0x180   :  { %v1462_v3 = vpop.f32.mrf.mxu0 }
 0x181   :  { %v1460_v9 = vadd.f32 %v1459_v60, %v1411_v14 }
 0x183   :  { %v1493_v16 = vmul.f32 %v3112_v23, %v1460_v9 }
 0x184   :  { %v1364_v6 = vpop.f32.mrf.mxu2 }
 0x185   :  { %v1513_v19 = vadd.f32 %v3119_v48, %v1493_v16  ;;  %v1365_v20 = vadd.f32 %v1364_v6, %v1316_v13 }
 0x186   :  { %v1413_v37 = vpop.f32.mrf.mxu3  ;;  %v1317_v12 = vpop.f32.mrf.mxu1 }
 0x187   :  { %v1529_v24 = vmax.f32 %v1513_v19, 0.0  ;;  %v1414_v26 = vadd.f32 %v1413_v37, %v1365_v20  ;;  %v1318_v34 = vadd.f32 %v1317_v12, %v3040_v8 }
 0x188   :  { %v1464_v27 = vpop.f32.mrf.mxu0 }
 0x189   :  { %v2312_v28 = vpack.c.bf16 %v1529_v24, %v1528_v10  ;;  %v1463_v29 = vadd.f32 %v1462_v3, %v1414_v26 }
 0x18b   :  { %2336 = vst [vmem:[%s3194_s4 + $0x18] sm:$0xff] %v2312_v28   ;;  %v1494_v11 = vmul.f32 %v3112_v23, %v1463_v29 }
 0x18c   :  { %v1366_v30 = vpop.f32.mrf.mxu2 }
 0x18d   :  { %v1367_v47 = vadd.f32 %v1366_v30, %v1318_v34  ;;  %v1514_v22 = vadd.f32 %v3119_v48, %v1494_v11 }
 0x18e   :  { %v1415_v31 = vpop.f32.mrf.mxu3  ;;  %v1320_v32 = vpop.f32.mrf.mxu1 }
 0x18f   :  { %v1416_v35 = vadd.f32 %v1415_v31, %v1367_v47  ;;  %v1321_v44 = vadd.f32 %v1320_v32, %v3049_v21  ;;  %v1530_v46 = vmax.f32 %v1514_v22, 0.0 }
 0x190   :  { %v1467_v36 = vpop.f32.mrf.mxu0 }
 0x191   :  { %v1465_v38 = vadd.f32 %v1464_v27, %v1416_v35 }
 0x193   :  { %v1495_v39 = vmul.f32 %v3112_v23, %v1465_v38 }
 0x194   :  { %v1369_v41 = vpop.f32.mrf.mxu2 }
 0x195   :  { %v1515_v43 = vadd.f32 %v3119_v48, %v1495_v39  ;;  %v1370_v50 = vadd.f32 %v1369_v41, %v1321_v44 }
 0x196   :  { %v1418_v8 = vpop.f32.mrf.mxu3  ;;  %v1322_v45 = vpop.f32.mrf.mxu1 }
 0x197   :  { %v1531_v56 = vmax.f32 %v1515_v43, 0.0  ;;  %v1419_v54 = vadd.f32 %v1418_v8, %v1370_v50  ;;  %v1323_v55 = vadd.f32 %v1322_v45, %v3070_v42 }
 0x198   :  { %v1469_v40 = vpop.f32.mrf.mxu0 }
 0x199   :  { %v2317_v49 = vpack.c.bf16 %v1531_v56, %v1530_v46  ;;  %v1468_v51 = vadd.f32 %v1467_v36, %v1419_v54 }
 0x19b   :  { %2337 = vst [vmem:[%s3194_s4 + $0x20] sm:$0xff] %v2317_v49   ;;  %v1496_v62 = vmul.f32 %v3112_v23, %v1468_v51 }
 0x19c   :  { %v1371_v53 = vpop.f32.mrf.mxu2 }
 0x19d   :  { %v1372_v21 = vadd.f32 %v1371_v53, %v1323_v55  ;;  %v1516_v61 = vadd.f32 %v3119_v48, %v1496_v62 }
 0x19e   :  { %v1420_v4 = vpop.f32.mrf.mxu3  ;;  %v1325_v57 = vpop.f32.mrf.mxu1 }
 0x19f   :  { %v1421_v58 = vadd.f32 %v1420_v4, %v1372_v21  ;;  %v1326_v0 = vadd.f32 %v1325_v57, %v3079_v52  ;;  %v1532_v7 = vmax.f32 %v1516_v61, 0.0 }
 0x1a0   :  { %v1472_v60 = vpop.f32.mrf.mxu0 }
 0x1a1   :  { %v1470_v59 = vadd.f32 %v1469_v40, %v1421_v58 }
 0x1a3   :  { %v1497_v63 = vmul.f32 %v3112_v23, %v1470_v59 }
 0x1a4   :  { %v1374_v1 = vpop.f32.mrf.mxu2 }
 0x1a5   :  { %v1517_v18 = vadd.f32 %v3119_v48, %v1497_v63  ;;  %v1375_v2 = vadd.f32 %v1374_v1, %v1326_v0 }
 0x1a6   :  { %v1423_v42 = vpop.f32.mrf.mxu3  ;;  %v1327_v5 = vpop.f32.mrf.mxu1 }
 0x1a7   :  { %v1533_v14 = vmax.f32 %v1517_v18, 0.0  ;;  %v1424_v3 = vadd.f32 %v1423_v42, %v1375_v2  ;;  %v1328_v16 = vadd.f32 %v1327_v5, %v3100_v17 }
 0x1a8   :  { %v1474_v13 = vpop.f32.mrf.mxu0 }
 0x1a9   :  { %v2322_v9 = vpack.c.bf16 %v1533_v14, %v1532_v7  ;;  %v1473_v15 = vadd.f32 %v1472_v60, %v1424_v3 }
 0x1ab   :  { %2338 = vst [vmem:[%s3194_s4 + $0x28] sm:$0xff] %v2322_v9   ;;  %v1498_v37 = vmul.f32 %v3112_v23, %v1473_v15 }
 0x1ac   :  { %v1376_v6 = vpop.f32.mrf.mxu2 }
 0x1ad   :  { %v1377_v52 = vadd.f32 %v1376_v6, %v1328_v16  ;;  %v1518_v24 = vadd.f32 %v3119_v48, %v1498_v37 }
 0x1ae   :  { %v1425_v19 = vpop.f32.mrf.mxu3  ;;  %v1330_v20 = vpop.f32.mrf.mxu1 }
 0x1af   :  { %v1426_v12 = vadd.f32 %v1425_v19, %v1377_v52  ;;  %v1331_v27 = vadd.f32 %v1330_v20, %v3103_v25  ;;  %v1534_v47 = vmax.f32 %v1518_v24, 0.0 }
 0x1b0   :  { %v1477_v30 = vpop.f32.mrf.mxu0 }
 0x1b1   :  { %v1475_v10 = vadd.f32 %v1474_v13, %v1426_v12 }
 0x1b3   :  { %v1499_v26 = vmul.f32 %v3112_v23, %v1475_v10 }
 0x1b4   :  { %v1379_v28 = vpop.f32.mrf.mxu2 }
 0x1b5   :  { %v1519_v29 = vadd.f32 %v3119_v48, %v1499_v26  ;;  %v1380_v34 = vadd.f32 %v1379_v28, %v1331_v27 }
 0x1b6   :  { %v1428_v17 = vpop.f32.mrf.mxu3  ;;  %v1332_v11 = vpop.f32.mrf.mxu1 }
 0x1b7   :  { %v1535_v31 = vmax.f32 %v1519_v29, 0.0  ;;  %v1429_v32 = vadd.f32 %v1428_v17, %v1380_v34  ;;  %v1333_v38 = vadd.f32 %v1332_v11, %v3106_v33 }
 0x1b8   :  { %v1479_v43 = vpop.f32.mrf.mxu0 }
 0x1b9   :  { %v2327_v35 = vpack.c.bf16 %v1535_v31, %v1534_v47  ;;  %v1478_v36 = vadd.f32 %v1477_v30, %v1429_v32 }
 0x1bb   :  { %2339 = vst [vmem:[%s3194_s4 + $0x30] sm:$0xff] %v2327_v35   ;;  %v1500_v44 = vmul.f32 %v3112_v23, %v1478_v36 }
 0x1bc   :  { %v1381_v22 = vpop.f32.mrf.mxu2 }
 0x1bd   :  { %v1382_v25 = vadd.f32 %v1381_v22, %v1333_v38  ;;  %v1520_v8 = vadd.f32 %v3119_v48, %v1500_v44 }
 0x1be   :  { %v1430_v39 = vpop.f32.mrf.mxu3 }
 0x1bf   :  { %v1431_v41 = vadd.f32 %v1430_v39, %v1382_v25  ;;  %v1536_v56 = vmax.f32 %v1520_v8, 0.0 }
 0x1c1   :  { %v1480_v50 = vadd.f32 %v1479_v43, %v1431_v41 }
 0x1c3   :  { %v1501_v45 = vmul.f32 %v3112_v23, %v1480_v50 }
 0x1c5   :  { %v1521_v46 = vadd.f32 %v3119_v48, %v1501_v45 }
 0x1c7   :  { %v1537_v54 = vmax.f32 %v1521_v46, 0.0 }
 0x1c9   :  { %v2332_v40 = vpack.c.bf16 %v1537_v54, %v1536_v56 }
 0x1cb   :  { %2340 = vst [vmem:[%s3194_s4 + $0x38] sm:$0xff] %v2332_v40  }

// kernel: basic_block_forward.5
= control target key start
LH: loop header
LB: loop body
LE: loop exit
PB: predicated region body
PF: predicated region fallthrough
CT: control target
= control target key end

     0   :  { %s3289_s1 = inlined_call_operand.vmem [shape: bf16[1152,128], index: 1, kind: input, shape index: {}]   ;;  %s3290_s0 = inlined_call_operand.vmem [shape: bf16[128,1152], index: 0, kind: input, shape index: {}]   ;;  %s3291_s2 = inlined_call_operand.vmem [shape: f32[1,128], index: 2, kind: input, shape index: {}]   ;;  %s3292_s3 = inlined_call_operand.vmem [shape: f32[1,128], index: 3, kind: input, shape index: {}]   ;;  %s3293_s5 = inlined_call_operand.vmem [shape: f32[1,128], index: 5, kind: input, shape index: {}]   ;;  %s3294_s4 = inlined_call_operand.vmem [shape: f32[128,128], index: 4, kind: input, shape index: {}]   ;;  %s3295_s6 = inlined_call_operand.vmem [shape: f32[128,128], index: 6, kind: output, shape index: {}]  }
   0x1   :  { %v2271_v0 = vld [vmem:[%s3289_s1 + $0x38] sm:$0xff]  ;;  %v2270_v1 = vld [vmem:[%s3289_s1 + $0x30] sm:$0xff]  ;;  %v2269_v2 = vld [vmem:[%s3289_s1 + $0x28] sm:$0xff] }
   0x2   :  { %2336 = vmatpush.bf16.msra.mxu1 %v2271_v0  ;;  %2337 = vmatpush.bf16.msra.mxu2 %v2271_v0  ;;  %v2268_v3 = vld [vmem:[%s3289_s1 + $0x20] sm:$0xff]  ;;  %v2267_v4 = vld [vmem:[%s3289_s1 + $0x18] sm:$0xff]  ;;  %v2266_v5 = vld [vmem:[%s3289_s1 + $0x10] sm:$0xff] }
   0x3   :  { %2338 = vmatpush.bf16.msra.mxu3 %v2271_v0  ;;  %1047 = vmatpush.bf16.msra.mxu0 %v2271_v0  ;;  %v2265_v6 = vld [vmem:[%s3289_s1 + $0x8] sm:$0xff]  ;;  %v2264_v7 = vld [vmem:[%s3289_s1] sm:$0xff]  ;;  %v1690_v8 = vld [vmem:[%s3290_s0 + $0x90] sm:$0xf] }
   0x4   :  { %v2214_v9 = vld [vmem:[%s3290_s0 + $0xb0] sm:$0xf0]  ;;  %v1762_v10 = vld [vmem:[%s3290_s0 + $0x120] sm:$0xf]  ;;  %v2232_v11 = vld [vmem:[%s3290_s0 + $0x140] sm:$0xf0] }
   0x5   :  { %v1834_v12 = vld [vmem:[%s3290_s0 + $0x1b0] sm:$0xf]  ;;  %v2250_v13 = vld [vmem:[%s3290_s0 + $0x1d0] sm:$0xf0]  ;;  %v1618_v14 = vld [vmem:[%s3290_s0] sm:$0xf]  ;;  %v1691_v18 = vor.u32 %v2214_v9, %v1690_v8  ;;  %v1763_v19 = vor.u32 %v2232_v11, %v1762_v10 }
   0x6   :  { %2339 = vmatpush.bf16.msra.mxu1 %v2270_v1  ;;  %2340 = vmatpush.bf16.msra.mxu2 %v2270_v1  ;;  %v2196_v15 = vld [vmem:[%s3290_s0 + $0x20] sm:$0xf0]  ;;  %v2287_v16 = vld [vmem:[%s3289_s1 + $0xb8] sm:$0xff]  ;;  %v1835_v20 = vor.u32 %v2250_v13, %v1834_v12  ;;  %v2286_v24 = vld [vmem:[%s3289_s1 + $0xb0] sm:$0xff] }
   0x7   :  { %2341 = vmatpush.bf16.msra.mxu3 %v2270_v1  ;;  %1048 = vmatpush.bf16.msra.mxu0 %v2270_v1  ;;  %v2279_v17 = vld [vmem:[%s3289_s1 + $0x78] sm:$0xff]  ;;  %v1619_v21 = vor.u32 %v2196_v15, %v1618_v14  ;;  %v2278_v25 = vld [vmem:[%s3289_s1 + $0x70] sm:$0xff]  ;;  %v2285_v28 = vld [vmem:[%s3289_s1 + $0xa8] sm:$0xff] }
   0x8   :  { %v2295_v22 = vld [vmem:[%s3289_s1 + $0xf8] sm:$0xff]  ;;  %v2294_v26 = vld [vmem:[%s3289_s1 + $0xf0] sm:$0xff]  ;;  %v2277_v29 = vld [vmem:[%s3289_s1 + $0x68] sm:$0xff] }
   0x9   :  { %v2303_v23 = vld [vmem:[%s3289_s1 + $0x138] sm:$0xff]  ;;  %v2302_v27 = vld [vmem:[%s3289_s1 + $0x130] sm:$0xff]  ;;  %v2293_v30 = vld [vmem:[%s3289_s1 + $0xe8] sm:$0xff] }
   0xa   :  { %2342 = vmatpush.bf16.msra.mxu1 %v2269_v2  ;;  %2343 = vmatpush.bf16.msra.mxu2 %v2269_v2  ;;  %v2301_v31 = vld [vmem:[%s3289_s1 + $0x128] sm:$0xff]  ;;  %v2284_v32 = vld [vmem:[%s3289_s1 + $0xa0] sm:$0xff]  ;;  %v1726_v36 = vld [vmem:[%s3290_s0 + $0xd8] sm:$0xf] }
   0xb   :  { %2344 = vmatpush.bf16.msra.mxu3 %v2269_v2  ;;  %1049 = vmatpush.bf16.msra.mxu0 %v2269_v2  ;;  %v2276_v33 = vld [vmem:[%s3289_s1 + $0x60] sm:$0xff]  ;;  %v2223_v37 = vld [vmem:[%s3290_s0 + $0xf8] sm:$0xf0]  ;;  %v1798_v38 = vld [vmem:[%s3290_s0 + $0x168] sm:$0xf] }
   0xc   :  { %v2292_v34 = vld [vmem:[%s3289_s1 + $0xe0] sm:$0xff]  ;;  %v2241_v39 = vld [vmem:[%s3290_s0 + $0x188] sm:$0xf0]  ;;  %v1870_v40 = vld [vmem:[%s3290_s0 + $0x1f8] sm:$0xf]  ;;  %v1727_v46 = vor.u32 %v2223_v37, %v1726_v36 }
   0xd   :  { %v2300_v35 = vld [vmem:[%s3289_s1 + $0x120] sm:$0xff]  ;;  %v2259_v41 = vld [vmem:[%s3290_s0 + $0x218] sm:$0xf0]  ;;  %v1654_v42 = vld [vmem:[%s3290_s0 + $0x48] sm:$0xf]  ;;  %v1799_v47 = vor.u32 %v2241_v39, %v1798_v38 }
   0xe   :  { %2345 = vmatpush.bf16.msra.mxu1 %v2268_v3  ;;  %2346 = vmatpush.bf16.msra.mxu2 %v2268_v3  ;;  %v2205_v43 = vld [vmem:[%s3290_s0 + $0x68] sm:$0xf0]  ;;  %v2283_v44 = vld [vmem:[%s3289_s1 + $0x98] sm:$0xff]  ;;  %v1871_v48 = vor.u32 %v2259_v41, %v1870_v40  ;;  %v2282_v52 = vld [vmem:[%s3289_s1 + $0x90] sm:$0xff] }
   0xf   :  { %2347 = vmatpush.bf16.msra.mxu3 %v2268_v3  ;;  %1050 = vmatpush.bf16.msra.mxu0 %v2268_v3  ;;  %v2275_v45 = vld [vmem:[%s3289_s1 + $0x58] sm:$0xff]  ;;  %v1655_v49 = vor.u32 %v2205_v43, %v1654_v42  ;;  %v2274_v53 = vld [vmem:[%s3289_s1 + $0x50] sm:$0xff]  ;;  %v2281_v56 = vld [vmem:[%s3289_s1 + $0x88] sm:$0xff] }
  0x10   :  { %v2291_v50 = vld [vmem:[%s3289_s1 + $0xd8] sm:$0xff]  ;;  %v2290_v54 = vld [vmem:[%s3289_s1 + $0xd0] sm:$0xff]  ;;  %v2273_v57 = vld [vmem:[%s3289_s1 + $0x48] sm:$0xff] }
  0x11   :  { %v2299_v51 = vld [vmem:[%s3289_s1 + $0x118] sm:$0xff]  ;;  %v2298_v55 = vld [vmem:[%s3289_s1 + $0x110] sm:$0xff]  ;;  %v2289_v58 = vld [vmem:[%s3289_s1 + $0xc8] sm:$0xff] }
  0x12   :  { %2348 = vmatpush.bf16.msra.mxu1 %v2267_v4  ;;  %2349 = vmatpush.bf16.msra.mxu2 %v2267_v4  ;;  %v2297_v59 = vld [vmem:[%s3289_s1 + $0x108] sm:$0xff]  ;;  %v2280_v60 = vld [vmem:[%s3289_s1 + $0x80] sm:$0xff]  ;;  %v2319_v2 = vld [vmem:[%s3289_s1 + $0x1b8] sm:$0xff] }
  0x13   :  { %2350 = vmatpush.bf16.msra.mxu3 %v2267_v4  ;;  %1051 = vmatpush.bf16.msra.mxu0 %v2267_v4  ;;  %v2272_v61 = vld [vmem:[%s3289_s1 + $0x40] sm:$0xff]  ;;  %v1620_v1 = vld [vmem:[%s3290_s0 + $0x24] sm:$0xf0]  ;;  %v2311_v3 = vld [vmem:[%s3289_s1 + $0x178] sm:$0xff] }
  0x14   :  { %v2192_v62 = vld [vmem:[%s3290_s0 + $0x4] sm:$0xf]  ;;  %v1626_v4 = vld [vmem:[%s3290_s0 + $0x8] sm:$0xf]  ;;  %v1634_v8 = vld [vmem:[%s3290_s0 + $0x10] sm:$0xf] }
  0x15   :  { %v2288_v63 = vld [vmem:[%s3289_s1 + $0xc0] sm:$0xff]  ;;  %v2198_v9 = vld [vmem:[%s3290_s0 + $0x30] sm:$0xf0]  ;;  %v2327_v10 = vld [vmem:[%s3289_s1 + $0x1f8] sm:$0xff]  ;;  %v1623_v12 = vor.u32 %v2192_v62, %v1620_v1 }
  0x16   :  { %2351 = vmatpush.bf16.msra.mxu1 %v2266_v5  ;;  %2352 = vmatpush.bf16.msra.mxu2 %v2266_v5  ;;  %v2296_v0 = vld [vmem:[%s3289_s1 + $0x100] sm:$0xff]  ;;  %v2335_v11 = vld [vmem:[%s3289_s1 + $0x238] sm:$0xff]  ;;  %v1635_v15 = vor.u32 %v2198_v9, %v1634_v8  ;;  %v2210_v40 = vld [vmem:[%s3290_s0 + $0x94] sm:$0xf] }
  0x17   :  { %2353 = vmatpush.bf16.msra.mxu3 %v2266_v5  ;;  %1052 = vmatpush.bf16.msra.mxu0 %v2266_v5  ;;  %v2197_v5 = vld [vmem:[%s3290_s0 + $0x28] sm:$0xf0]  ;;  %v2316_v36 = vld [vmem:[%s3289_s1 + $0x1a0] sm:$0xff]  ;;  %v1692_v41 = vld [vmem:[%s3290_s0 + $0xb4] sm:$0xf0] }
  0x18   :  { %v1627_v13 = vor.u32 %v2197_v5, %v1626_v4  ;;  %v2324_v37 = vld [vmem:[%s3289_s1 + $0x1e0] sm:$0xff]  ;;  %v1698_v42 = vld [vmem:[%s3290_s0 + $0x98] sm:$0xf]  ;;  %v2215_v43 = vld [vmem:[%s3290_s0 + $0xb8] sm:$0xf0] }
  0x19   :  { %v2308_v38 = vld [vmem:[%s3289_s1 + $0x160] sm:$0xff]  ;;  %v1742_v62 = vld [vmem:[%s3290_s0 + $0xe8] sm:$0xf]  ;;  %v2314_v4 = vld [vmem:[%s3289_s1 + $0x190] sm:$0xff] }
  0x1a   :  { %2354 = vmatpush.bf16.msra.mxu1 %v2265_v6  ;;  %2355 = vmatpush.bf16.msra.mxu2 %v2265_v6  ;;  %v2332_v39 = vld [vmem:[%s3289_s1 + $0x220] sm:$0xff]  ;;  %v2322_v5 = vld [vmem:[%s3289_s1 + $0x1d0] sm:$0xff]  ;;  %v1764_v9 = vld [vmem:[%s3290_s0 + $0x144] sm:$0xf0] }
  0x1b   :  { %2356 = vmatpush.bf16.msra.mxu3 %v2265_v6  ;;  %1053 = vmatpush.bf16.msra.mxu0 %v2265_v6  ;;  %v2193_v6 = vld [vmem:[%s3290_s0 + $0xc] sm:$0xf]  ;;  %v2228_v8 = vld [vmem:[%s3290_s0 + $0x124] sm:$0xf] }
  0x1e   :  { %2357 = vmatpush.bf16.msra.mxu1 %v2264_v7  ;;  %2358 = vmatpush.bf16.msra.mxu2 %v2264_v7 }
  0x1f   :  { %2359 = vmatpush.bf16.msra.mxu3 %v2264_v7  ;;  %1054 = vmatpush.bf16.msra.mxu0 %v2264_v7  ;;  %v1628_v7 = vld [vmem:[%s3290_s0 + $0x2c] sm:$0xf0] }
  0x20   :  { %v1631_v14 = vor.u32 %v2193_v6, %v1628_v7  ;;  %v2306_v6 = vld [vmem:[%s3289_s1 + $0x150] sm:$0xff] }
  0x21   :  { %1065 = vmatmul.bf16.vlgmr.msra.gmra.mxu1 %v1691_v18  ;;  %1075 = vmatmul.bf16.vlgmr.msra.gmra.mxu2 %v1763_v19  ;;  %v2326_v18 = vld [vmem:[%s3289_s1 + $0x1f0] sm:$0xff] }
  0x22   :  { %1145 = vmatpush.bf16.msrb.mxu2 %v2287_v16  ;;  %1096 = vmatpush.bf16.msrb.mxu1 %v2279_v17  ;;  %v2318_v16 = vld [vmem:[%s3289_s1 + $0x1b0] sm:$0xff] }
  0x23   :  { %1085 = vmatmul.bf16.vlgmr.msra.gmra.mxu3 %v1835_v20  ;;  %1055 = vmatmul.bf16.vlgmr.msra.gmra.mxu0 %v1619_v21  ;;  %v2310_v17 = vld [vmem:[%s3289_s1 + $0x170] sm:$0xff]  ;;  %v2317_v20 = vld [vmem:[%s3289_s1 + $0x1a8] sm:$0xff] }
  0x24   :  { %1194 = vmatpush.bf16.msrb.mxu3 %v2295_v22  ;;  %1243 = vmatpush.bf16.msrb.mxu0 %v2303_v23  ;;  %v2334_v19 = vld [vmem:[%s3289_s1 + $0x230] sm:$0xff]  ;;  %v2309_v21 = vld [vmem:[%s3289_s1 + $0x168] sm:$0xff] }
  0x25   :  { %v2325_v22 = vld [vmem:[%s3289_s1 + $0x1e8] sm:$0xff]  ;;  %v2330_v7 = vld [vmem:[%s3289_s1 + $0x210] sm:$0xff] }
  0x26   :  { %1146 = vmatpush.bf16.msrb.mxu2 %v2286_v24  ;;  %1097 = vmatpush.bf16.msrb.mxu1 %v2278_v25  ;;  %v2333_v23 = vld [vmem:[%s3289_s1 + $0x228] sm:$0xff]  ;;  %v1656_v25 = vld [vmem:[%s3290_s0 + $0x6c] sm:$0xf0] }
  0x27   :  { %v2201_v24 = vld [vmem:[%s3290_s0 + $0x4c] sm:$0xf] }
  0x28   :  { %1195 = vmatpush.bf16.msrb.mxu3 %v2294_v26  ;;  %1244 = vmatpush.bf16.msrb.mxu0 %v2302_v27  ;;  %v1662_v26 = vld [vmem:[%s3290_s0 + $0x50] sm:$0xf]  ;;  %v2206_v27 = vld [vmem:[%s3290_s0 + $0x70] sm:$0xf0] }
  0x2a   :  { %1147 = vmatpush.bf16.msrb.mxu2 %v2285_v28  ;;  %1098 = vmatpush.bf16.msrb.mxu1 %v2277_v29  ;;  %v2202_v28 = vld [vmem:[%s3290_s0 + $0x54] sm:$0xf]  ;;  %v1664_v29 = vld [vmem:[%s3290_s0 + $0x74] sm:$0xf0] }
  0x2c   :  { %1196 = vmatpush.bf16.msrb.mxu3 %v2293_v30  ;;  %1245 = vmatpush.bf16.msrb.mxu0 %v2301_v31  ;;  %v1670_v30 = vld [vmem:[%s3290_s0 + $0x58] sm:$0xf]  ;;  %v2207_v31 = vld [vmem:[%s3290_s0 + $0x78] sm:$0xf0] }
  0x2e   :  { %1148 = vmatpush.bf16.msrb.mxu2 %v2284_v32  ;;  %1099 = vmatpush.bf16.msrb.mxu1 %v2276_v33  ;;  %v1659_v32 = vor.u32 %v2201_v24, %v1656_v25  ;;  %v1663_v33 = vor.u32 %v2206_v27, %v1662_v26  ;;  %v2237_v24 = vld [vmem:[%s3290_s0 + $0x16c] sm:$0xf]  ;;  %v1800_v25 = vld [vmem:[%s3290_s0 + $0x18c] sm:$0xf0]  ;;  %v2242_v27 = vld [vmem:[%s3290_s0 + $0x190] sm:$0xf0] }
  0x2f   :  { %v1806_v26 = vld [vmem:[%s3290_s0 + $0x170] sm:$0xf] }
  0x30   :  { %1197 = vmatpush.bf16.msrb.mxu3 %v2292_v34  ;;  %1246 = vmatpush.bf16.msrb.mxu0 %v2300_v35  ;;  %v1667_v34 = vor.u32 %v2202_v28, %v1664_v29  ;;  %v1671_v35 = vor.u32 %v2207_v31, %v1670_v30  ;;  %v2238_v28 = vld [vmem:[%s3290_s0 + $0x174] sm:$0xf]  ;;  %v1808_v29 = vld [vmem:[%s3290_s0 + $0x194] sm:$0xf0]  ;;  %v2243_v31 = vld [vmem:[%s3290_s0 + $0x198] sm:$0xf0] }
  0x31   :  { %1070 = vmatmul.bf16.gmra.mxu1 %v1727_v46  ;;  %1080 = vmatmul.bf16.gmra.mxu2 %v1799_v47  ;;  %v1706_v46 = vld [vmem:[%s3290_s0 + $0xa0] sm:$0xf]  ;;  %v2216_v47 = vld [vmem:[%s3290_s0 + $0xc0] sm:$0xf0]  ;;  %v1814_v30 = vld [vmem:[%s3290_s0 + $0x178] sm:$0xf] }
  0x32   :  { %1149 = vmatpush.bf16.msrb.mxu2 %v2283_v44  ;;  %1100 = vmatpush.bf16.msrb.mxu1 %v2275_v45  ;;  %v2211_v44 = vld [vmem:[%s3290_s0 + $0x9c] sm:$0xf]  ;;  %v1700_v45 = vld [vmem:[%s3290_s0 + $0xbc] sm:$0xf0] }
  0x33   :  { %1090 = vmatmul.bf16.gmra.mxu3 %v1871_v48  ;;  %1060 = vmatmul.bf16.gmra.mxu0 %v1655_v49  ;;  %v1695_v48 = vor.u32 %v2210_v40, %v1692_v41  ;;  %v1699_v49 = vor.u32 %v2215_v43, %v1698_v42  ;;  %v2246_v40 = vld [vmem:[%s3290_s0 + $0x1b4] sm:$0xf]  ;;  %v1836_v41 = vld [vmem:[%s3290_s0 + $0x1d4] sm:$0xf0]  ;;  %v2251_v43 = vld [vmem:[%s3290_s0 + $0x1d8] sm:$0xf0] }
  0x34   :  { %1198 = vmatpush.bf16.msrb.mxu3 %v2291_v50  ;;  %1247 = vmatpush.bf16.msrb.mxu0 %v2299_v51  ;;  %v1703_v50 = vor.u32 %v2211_v44, %v1700_v45  ;;  %v1707_v51 = vor.u32 %v2216_v47, %v1706_v46  ;;  %v1842_v42 = vld [vmem:[%s3290_s0 + $0x1b8] sm:$0xf]  ;;  %v2247_v44 = vld [vmem:[%s3290_s0 + $0x1bc] sm:$0xf]  ;;  %v1844_v45 = vld [vmem:[%s3290_s0 + $0x1dc] sm:$0xf0] }
  0x35   :  { %v1850_v46 = vld [vmem:[%s3290_s0 + $0x1c0] sm:$0xf]  ;;  %v2252_v47 = vld [vmem:[%s3290_s0 + $0x1e0] sm:$0xf0] }
  0x36   :  { %1150 = vmatpush.bf16.msrb.mxu2 %v2282_v52  ;;  %1101 = vmatpush.bf16.msrb.mxu1 %v2274_v53  ;;  %v2315_v52 = vld [vmem:[%s3289_s1 + $0x198] sm:$0xff] }
  0x37   :  { %v2323_v53 = vld [vmem:[%s3289_s1 + $0x1d8] sm:$0xff] }
  0x38   :  { %1199 = vmatpush.bf16.msrb.mxu3 %v2290_v54  ;;  %1248 = vmatpush.bf16.msrb.mxu0 %v2298_v55  ;;  %v2307_v54 = vld [vmem:[%s3289_s1 + $0x158] sm:$0xff] }
  0x39   :  { %v2331_v55 = vld [vmem:[%s3289_s1 + $0x218] sm:$0xff] }
  0x3a   :  { %1151 = vmatpush.bf16.msrb.mxu2 %v2281_v56  ;;  %1102 = vmatpush.bf16.msrb.mxu1 %v2273_v57  ;;  %v2219_v56 = vld [vmem:[%s3290_s0 + $0xdc] sm:$0xf]  ;;  %v1728_v57 = vld [vmem:[%s3290_s0 + $0xfc] sm:$0xf0] }
  0x3c   :  { %1200 = vmatpush.bf16.msrb.mxu3 %v2289_v58  ;;  %1249 = vmatpush.bf16.msrb.mxu0 %v2297_v59  ;;  %v1734_v58 = vld [vmem:[%s3290_s0 + $0xe0] sm:$0xf]  ;;  %v2224_v59 = vld [vmem:[%s3290_s0 + $0x100] sm:$0xf0] }
  0x3d   :  { %v1735_v1 = vor.u32 %v2224_v59, %v1734_v58  ;;  %v2255_v58 = vld [vmem:[%s3290_s0 + $0x1fc] sm:$0xf]  ;;  %v1872_v59 = vld [vmem:[%s3290_s0 + $0x21c] sm:$0xf0] }
  0x3e   :  { %1152 = vmatpush.bf16.msrb.mxu2 %v2280_v60  ;;  %1103 = vmatpush.bf16.msrb.mxu1 %v2272_v61  ;;  %v2220_v60 = vld [vmem:[%s3290_s0 + $0xe4] sm:$0xf]  ;;  %v1736_v61 = vld [vmem:[%s3290_s0 + $0x104] sm:$0xf0] }
  0x40   :  { %1201 = vmatpush.bf16.msrb.mxu3 %v2288_v63  ;;  %1250 = vmatpush.bf16.msrb.mxu0 %v2296_v0  ;;  %v2225_v63 = vld [vmem:[%s3290_s0 + $0x108] sm:$0xf0]  ;;  %v1731_v0 = vor.u32 %v2219_v56, %v1728_v57 }
  0x41   :  { %1104 = vmatmul.bf16.vlgmr.msrb.gmra.mxu1 %v1623_v12  ;;  %1153 = vmatmul.bf16.vlgmr.msrb.gmra.mxu2 %v1627_v13  ;;  %v2229_v12 = vld [vmem:[%s3290_s0 + $0x12c] sm:$0xf]  ;;  %v1772_v13 = vld [vmem:[%s3290_s0 + $0x14c] sm:$0xf0] }
  0x42   :  { %1341 = vmatpush.bf16.msra.mxu2 %v2319_v2  ;;  %1292 = vmatpush.bf16.msra.mxu1 %v2311_v3  ;;  %v1739_v2 = vor.u32 %v2220_v60, %v1736_v61  ;;  %v1743_v3 = vor.u32 %v2225_v63, %v1742_v62  ;;  %v1878_v60 = vld [vmem:[%s3290_s0 + $0x200] sm:$0xf]  ;;  %v2260_v61 = vld [vmem:[%s3290_s0 + $0x220] sm:$0xf0]  ;;  %v1880_v63 = vld [vmem:[%s3290_s0 + $0x224] sm:$0xf0] }
  0x43   :  { %1202 = vmatmul.bf16.vlgmr.msrb.gmra.mxu3 %v1631_v14  ;;  %1251 = vmatmul.bf16.vlgmr.msrb.gmra.mxu0 %v1635_v15  ;;  %v1778_v14 = vld [vmem:[%s3290_s0 + $0x130] sm:$0xf]  ;;  %v2234_v15 = vld [vmem:[%s3290_s0 + $0x150] sm:$0xf0]  ;;  %v2256_v62 = vld [vmem:[%s3290_s0 + $0x204] sm:$0xf] }
  0x44   :  { %1390 = vmatpush.bf16.msra.mxu3 %v2327_v10  ;;  %1439 = vmatpush.bf16.msra.mxu0 %v2335_v11  ;;  %v1770_v10 = vld [vmem:[%s3290_s0 + $0x128] sm:$0xf]  ;;  %v2233_v11 = vld [vmem:[%s3290_s0 + $0x148] sm:$0xf0] }
  0x46   :  { %1342 = vmatpush.bf16.msra.mxu2 %v2318_v16  ;;  %1293 = vmatpush.bf16.msra.mxu1 %v2310_v17  ;;  %v1767_v16 = vor.u32 %v2228_v8, %v1764_v9  ;;  %v1771_v17 = vor.u32 %v2233_v11, %v1770_v10 }
  0x48   :  { %1391 = vmatpush.bf16.msra.mxu3 %v2326_v18  ;;  %1440 = vmatpush.bf16.msra.mxu0 %v2334_v19  ;;  %v1775_v18 = vor.u32 %v2229_v12, %v1772_v13  ;;  %v1779_v19 = vor.u32 %v2234_v15, %v1778_v14  ;;  %v2194_v14 = vld [vmem:[%s3290_s0 + $0x14] sm:$0xf]  ;;  %v1636_v15 = vld [vmem:[%s3290_s0 + $0x34] sm:$0xf0] }
  0x4a   :  { %1343 = vmatpush.bf16.msra.mxu2 %v2317_v20  ;;  %1294 = vmatpush.bf16.msra.mxu1 %v2309_v21  ;;  %v2313_v20 = vld [vmem:[%s3289_s1 + $0x188] sm:$0xff] }
  0x4b   :  { %v2321_v21 = vld [vmem:[%s3289_s1 + $0x1c8] sm:$0xff] }
  0x4c   :  { %1392 = vmatpush.bf16.msra.mxu3 %v2325_v22  ;;  %1441 = vmatpush.bf16.msra.mxu0 %v2333_v23  ;;  %v2305_v22 = vld [vmem:[%s3289_s1 + $0x148] sm:$0xff] }
  0x4d   :  { %v2329_v23 = vld [vmem:[%s3289_s1 + $0x208] sm:$0xff] }
  0x4e   :  { %1344 = vmatpush.bf16.msra.mxu2 %v2316_v36  ;;  %1295 = vmatpush.bf16.msra.mxu1 %v2308_v38  ;;  %v2312_v36 = vld [vmem:[%s3289_s1 + $0x180] sm:$0xff] }
  0x4f   :  { %v2304_v38 = vld [vmem:[%s3289_s1 + $0x140] sm:$0xff] }
  0x50   :  { %1393 = vmatpush.bf16.msra.mxu3 %v2324_v37  ;;  %1442 = vmatpush.bf16.msra.mxu0 %v2332_v39  ;;  %v2320_v37 = vld [vmem:[%s3289_s1 + $0x1c0] sm:$0xff] }
  0x51   :  { %1109 = vmatmul.bf16.gmra.mxu1 %v1659_v32  ;;  %1158 = vmatmul.bf16.gmra.mxu2 %v1663_v33  ;;  %v1803_v32 = vor.u32 %v2237_v24, %v1800_v25  ;;  %v1807_v33 = vor.u32 %v2242_v27, %v1806_v26  ;;  %v2328_v39 = vld [vmem:[%s3289_s1 + $0x200] sm:$0xff]  ;;  %v1639_v24 = vor.u32 %v2194_v14, %v1636_v15 }
  0x52   :  { %1345 = vmatpush.bf16.msra.mxu2 %v2315_v52  ;;  %1296 = vmatpush.bf16.msra.mxu1 %v2307_v54  ;;  %v1851_v52 = vor.u32 %v2252_v47, %v1850_v46  ;;  %v2209_v46 = vld [vmem:[%s3290_s0 + $0x88] sm:$0xf0]  ;;  %v2212_v14 = vld [vmem:[%s3290_s0 + $0xa4] sm:$0xf] }
  0x53   :  { %1207 = vmatmul.bf16.gmra.mxu3 %v1667_v34  ;;  %1256 = vmatmul.bf16.gmra.mxu0 %v1671_v35  ;;  %v1811_v34 = vor.u32 %v2238_v28, %v1808_v29  ;;  %v1815_v35 = vor.u32 %v2243_v31, %v1814_v30 }
  0x54   :  { %1394 = vmatpush.bf16.msra.mxu3 %v2323_v53  ;;  %1443 = vmatpush.bf16.msra.mxu0 %v2331_v55 }
  0x56   :  { %1346 = vmatpush.bf16.msra.mxu2 %v2314_v4  ;;  %1297 = vmatpush.bf16.msra.mxu1 %v2306_v6  ;;  %v1875_v4 = vor.u32 %v2255_v58, %v1872_v59 }
  0x58   :  { %1395 = vmatpush.bf16.msra.mxu3 %v2322_v5  ;;  %1444 = vmatpush.bf16.msra.mxu0 %v2330_v7  ;;  %v1879_v5 = vor.u32 %v2260_v61, %v1878_v60  ;;  %v1883_v7 = vor.u32 %v2256_v62, %v1880_v63 }
  0x5a   :  { %1347 = vmatpush.bf16.msra.mxu2 %v2313_v20  ;;  %1298 = vmatpush.bf16.msra.mxu1 %v2305_v22  ;;  %v1650_v20 = vld [vmem:[%s3290_s0 + $0x20] sm:$0xf] }
  0x5c   :  { %1396 = vmatpush.bf16.msra.mxu3 %v2321_v21  ;;  %1445 = vmatpush.bf16.msra.mxu0 %v2329_v23  ;;  %v2200_v21 = vld [vmem:[%s3290_s0 + $0x40] sm:$0xf0] }
  0x5d   :  { %v1651_v28 = vor.u32 %v2200_v21, %v1650_v20  ;;  %v2218_v20 = vld [vmem:[%s3290_s0 + $0xd0] sm:$0xf0] }
  0x5e   :  { %1348 = vmatpush.bf16.msra.mxu2 %v2312_v36  ;;  %1299 = vmatpush.bf16.msra.mxu1 %v2304_v38  ;;  %v2203_v38 = vld [vmem:[%s3290_s0 + $0x5c] sm:$0xf] }
  0x60   :  { %1397 = vmatpush.bf16.msra.mxu3 %v2320_v37  ;;  %1446 = vmatpush.bf16.msra.mxu0 %v2328_v39  ;;  %v1672_v39 = vld [vmem:[%s3290_s0 + $0x7c] sm:$0xf0] }
  0x61   :  { %1114 = vmatmul.bf16.gmra.mxu1 %v1695_v48  ;;  %1163 = vmatmul.bf16.gmra.mxu2 %v1699_v49  ;;  %v1839_v48 = vor.u32 %v2246_v40, %v1836_v41  ;;  %v1843_v49 = vor.u32 %v2251_v43, %v1842_v42  ;;  %v1678_v41 = vld [vmem:[%s3290_s0 + $0x60] sm:$0xf]  ;;  %v2208_v42 = vld [vmem:[%s3290_s0 + $0x80] sm:$0xf0] }
  0x62   :  { %v2204_v43 = vld [vmem:[%s3290_s0 + $0x64] sm:$0xf] }
  0x63   :  { %1212 = vmatmul.bf16.gmra.mxu3 %v1703_v50  ;;  %1261 = vmatmul.bf16.gmra.mxu0 %v1707_v51  ;;  %v1847_v51 = vor.u32 %v2247_v44, %v1844_v45  ;;  %v1680_v44 = vld [vmem:[%s3290_s0 + $0x84] sm:$0xf0] }
  0x64   :  { %v1686_v45 = vld [vmem:[%s3290_s0 + $0x68] sm:$0xf] }
  0x65   :  { %v1687_v58 = vor.u32 %v2209_v46, %v1686_v45  ;;  %v1750_v45 = vld [vmem:[%s3290_s0 + $0xf0] sm:$0xf]  ;;  %v2226_v46 = vld [vmem:[%s3290_s0 + $0x110] sm:$0xf0] }
  0x71   :  { %1119 = vmatmul.bf16.gmra.mxu1 %v1731_v0  ;;  %1168 = vmatmul.bf16.gmra.mxu2 %v1735_v1  ;;  %v1886_v0 = vld [vmem:[%s3290_s0 + $0x208] sm:$0xf]  ;;  %v2261_v1 = vld [vmem:[%s3290_s0 + $0x228] sm:$0xf0] }
  0x72   :  { %v1887_v8 = vor.u32 %v2261_v1, %v1886_v0 }
  0x73   :  { %1217 = vmatmul.bf16.gmra.mxu3 %v1739_v2  ;;  %1266 = vmatmul.bf16.gmra.mxu0 %v1743_v3 }
  0x81   :  { %1124 = vmatmul.bf16.gmra.mxu1 %v1767_v16  ;;  %1173 = vmatmul.bf16.gmra.mxu2 %v1771_v17  ;;  %v1642_v16 = vld [vmem:[%s3290_s0 + $0x18] sm:$0xf]  ;;  %v2199_v17 = vld [vmem:[%s3290_s0 + $0x38] sm:$0xf0] }
  0x82   :  { %v1643_v25 = vor.u32 %v2199_v17, %v1642_v16  ;;  %v1714_v16 = vld [vmem:[%s3290_s0 + $0xa8] sm:$0xf]  ;;  %v2217_v17 = vld [vmem:[%s3290_s0 + $0xc8] sm:$0xf0] }
  0x83   :  { %1222 = vmatmul.bf16.gmra.mxu3 %v1775_v18  ;;  %1271 = vmatmul.bf16.gmra.mxu0 %v1779_v19  ;;  %v2195_v18 = vld [vmem:[%s3290_s0 + $0x1c] sm:$0xf]  ;;  %v1644_v19 = vld [vmem:[%s3290_s0 + $0x3c] sm:$0xf0] }
  0x84   :  { %v1647_v27 = vor.u32 %v2195_v18, %v1644_v19  ;;  %v1716_v18 = vld [vmem:[%s3290_s0 + $0xcc] sm:$0xf0] }
  0x85   :  { %v1722_v19 = vld [vmem:[%s3290_s0 + $0xb0] sm:$0xf] }
  0x91   :  { %1129 = vmatmul.bf16.gmra.mxu1 %v1803_v32  ;;  %1178 = vmatmul.bf16.gmra.mxu2 %v1807_v33 }
  0x93   :  { %1227 = vmatmul.bf16.gmra.mxu3 %v1811_v34  ;;  %1276 = vmatmul.bf16.gmra.mxu0 %v1815_v35 }
  0x9e   :  { %v2830_v50 = vpop.f32.mrf.mxu1 }
  0xa0   :  { %v1056_v53 = vpop.f32.mrf.mxu0 }
  0xa1   :  { %1134 = vmatmul.bf16.gmra.mxu1 %v1839_v48  ;;  %1183 = vmatmul.bf16.gmra.mxu2 %v1843_v49 }
  0xa3   :  { %1232 = vmatmul.bf16.gmra.mxu3 %v1847_v51  ;;  %1281 = vmatmul.bf16.gmra.mxu0 %v1851_v52  ;;  %v1675_v51 = vor.u32 %v2203_v38, %v1672_v39  ;;  %v1679_v52 = vor.u32 %v2208_v42, %v1678_v41 }
  0xa4   :  { %v2832_v54 = vpop.f32.mrf.mxu2 }
  0xa6   :  { %v2834_v55 = vpop.f32.mrf.mxu3  ;;  %v2836_v56 = vpop.f32.mrf.mxu1 }
  0xa8   :  { %v1058_v57 = vpop.f32.mrf.mxu0 }
  0xac   :  { %v2862_v2 = vpop.f32.mrf.mxu2 }
  0xae   :  { %v2864_v3 = vpop.f32.mrf.mxu3  ;;  %v2866_v6 = vpop.f32.mrf.mxu1 }
  0xb0   :  { %v1061_v9 = vpop.f32.mrf.mxu0 }
  0xb1   :  { %1139 = vmatmul.bf16.gmra.mxu1 %v1875_v4  ;;  %1188 = vmatmul.bf16.gmra.mxu2 %v1879_v5 }
  0xb3   :  { %1237 = vmatmul.bf16.gmra.mxu3 %v1883_v7  ;;  %1286 = vmatmul.bf16.gmra.mxu0 %v1887_v8 }
  0xb4   :  { %v2868_v10 = vpop.f32.mrf.mxu2 }
  0xb6   :  { %v2870_v11 = vpop.f32.mrf.mxu3  ;;  %v2872_v12 = vpop.f32.mrf.mxu1 }
  0xb8   :  { %v1063_v13 = vpop.f32.mrf.mxu0 }
  0xbc   :  { %v2898_v22 = vpop.f32.mrf.mxu2 }
  0xbe   :  { %v2900_v23 = vpop.f32.mrf.mxu3  ;;  %v1105_v26 = vpop.f32.mrf.mxu1 }
  0xbf   :  { %v1106_v29 = vadd.f32 %v1105_v26, %v1056_v53 }
  0xc0   :  { %v1252_v30 = vpop.f32.mrf.mxu0 }
  0xc1   :  { %1300 = vmatmul.bf16.vlgmr.msra.gmra.mxu1 %v1639_v24  ;;  %1349 = vmatmul.bf16.vlgmr.msra.gmra.mxu2 %v1643_v25 }
  0xc3   :  { %1398 = vmatmul.bf16.vlgmr.msra.gmra.mxu3 %v1647_v27  ;;  %1447 = vmatmul.bf16.vlgmr.msra.gmra.mxu0 %v1651_v28  ;;  %v1715_v27 = vor.u32 %v2217_v17, %v1714_v16 }
  0xc4   :  { %v1154_v31 = vpop.f32.mrf.mxu2 }
  0xc5   :  { %v1155_v32 = vadd.f32 %v1154_v31, %v1106_v29 }
  0xc6   :  { %v1203_v33 = vpop.f32.mrf.mxu3  ;;  %v1107_v34 = vpop.f32.mrf.mxu1 }
  0xc7   :  { %v1204_v35 = vadd.f32 %v1203_v33, %v1155_v32  ;;  %v1108_v36 = vadd.f32 %v1107_v34, %v1058_v57  ;;  %v1683_v57 = vor.u32 %v2204_v43, %v1680_v44  ;;  %v2221_v43 = vld [vmem:[%s3290_s0 + $0xec] sm:$0xf] }
  0xc8   :  { %v1254_v37 = vpop.f32.mrf.mxu0 }
  0xc9   :  { %v2908_v40 = vadd.f32 %v1252_v30, %v1204_v35  ;;  %v1723_v30 = vor.u32 %v2218_v20, %v1722_v19  ;;  %v1786_v19 = vld [vmem:[%s3290_s0 + $0x138] sm:$0xf]  ;;  %v2235_v20 = vld [vmem:[%s3290_s0 + $0x158] sm:$0xf0] }
  0xcc   :  { %v1156_v47 = vpop.f32.mrf.mxu2 }
  0xcd   :  { %v1157_v48 = vadd.f32 %v1156_v47, %v1108_v36  ;;  %v1752_v47 = vld [vmem:[%s3290_s0 + $0x114] sm:$0xf0] }
  0xce   :  { %v1205_v49 = vpop.f32.mrf.mxu3  ;;  %v1110_v53 = vpop.f32.mrf.mxu1 }
  0xcf   :  { %v1206_v59 = vadd.f32 %v1205_v49, %v1157_v48  ;;  %v1111_v60 = vadd.f32 %v1110_v53, %v1061_v9  ;;  %v1708_v9 = vld [vmem:[%s3290_s0 + $0xc4] sm:$0xf0]  ;;  %v1758_v48 = vld [vmem:[%s3290_s0 + $0xf8] sm:$0xf]  ;;  %v2227_v49 = vld [vmem:[%s3290_s0 + $0x118] sm:$0xf0] }
  0xd0   :  { %v1257_v61 = vpop.f32.mrf.mxu0  ;;  %v1711_v26 = vor.u32 %v2212_v14, %v1708_v9 }
  0xd1   :  { %1305 = vmatmul.bf16.gmra.mxu1 %v1675_v51  ;;  %1354 = vmatmul.bf16.gmra.mxu2 %v1679_v52  ;;  %v2928_v62 = vadd.f32 %v1254_v37, %v1206_v59 }
  0xd3   :  { %1403 = vmatmul.bf16.gmra.mxu3 %v1683_v57  ;;  %1452 = vmatmul.bf16.gmra.mxu0 %v1687_v58  ;;  %v1751_v58 = vor.u32 %v2226_v46, %v1750_v45  ;;  %v2239_v46 = vld [vmem:[%s3290_s0 + $0x17c] sm:$0xf] }
  0xd4   :  { %v1159_v63 = vpop.f32.mrf.mxu2 }
  0xd5   :  { %v1160_v0 = vadd.f32 %v1159_v63, %v1111_v60 }
  0xd6   :  { %v1208_v1 = vpop.f32.mrf.mxu3  ;;  %v1112_v4 = vpop.f32.mrf.mxu1 }
  0xd7   :  { %v1209_v5 = vadd.f32 %v1208_v1, %v1160_v0  ;;  %v1113_v7 = vadd.f32 %v1112_v4, %v1063_v13  ;;  %v2213_v13 = vld [vmem:[%s3290_s0 + $0xac] sm:$0xf] }
  0xd8   :  { %v1259_v8 = vpop.f32.mrf.mxu0  ;;  %v1719_v29 = vor.u32 %v2213_v13, %v1716_v18  ;;  %v2230_v13 = vld [vmem:[%s3290_s0 + $0x134] sm:$0xf] }
  0xd9   :  { %v2936_v15 = vadd.f32 %v1257_v61, %v1209_v5  ;;  %v1759_v61 = vor.u32 %v2227_v49, %v1758_v48  ;;  %v2244_v48 = vld [vmem:[%s3290_s0 + $0x1a0] sm:$0xf0] }
  0xda   :  { %v2240_v49 = vld [vmem:[%s3290_s0 + $0x184] sm:$0xf] }
  0xdc   :  { %v1161_v21 = vpop.f32.mrf.mxu2 }
  0xdd   :  { %v1162_v24 = vadd.f32 %v1161_v21, %v1113_v7  ;;  %v1788_v21 = vld [vmem:[%s3290_s0 + $0x15c] sm:$0xf0] }
  0xde   :  { %v1210_v25 = vpop.f32.mrf.mxu3  ;;  %v1115_v28 = vpop.f32.mrf.mxu1 }
  0xdf   :  { %v1211_v31 = vadd.f32 %v1210_v25, %v1162_v24  ;;  %v1116_v32 = vadd.f32 %v1115_v28, %v2830_v50  ;;  %v1744_v50 = vld [vmem:[%s3290_s0 + $0x10c] sm:$0xf0]  ;;  %v1794_v24 = vld [vmem:[%s3290_s0 + $0x140] sm:$0xf]  ;;  %v2236_v25 = vld [vmem:[%s3290_s0 + $0x160] sm:$0xf0] }
  0xe0   :  { %v1262_v33 = vpop.f32.mrf.mxu0  ;;  %v1747_v57 = vor.u32 %v2221_v43, %v1744_v50 }
  0xe1   :  { %1310 = vmatmul.bf16.gmra.mxu1 %v1711_v26  ;;  %1359 = vmatmul.bf16.gmra.mxu2 %v1715_v27  ;;  %v2957_v34 = vadd.f32 %v1259_v8, %v1211_v31 }
  0xe3   :  { %1408 = vmatmul.bf16.gmra.mxu3 %v1719_v29  ;;  %1457 = vmatmul.bf16.gmra.mxu0 %v1723_v30  ;;  %v1787_v30 = vor.u32 %v2235_v20, %v1786_v19  ;;  %v2248_v20 = vld [vmem:[%s3290_s0 + $0x1c4] sm:$0xf] }
  0xe4   :  { %v1164_v35 = vpop.f32.mrf.mxu2 }
  0xe5   :  { %v1165_v36 = vadd.f32 %v1164_v35, %v1116_v32 }
  0xe6   :  { %v1213_v37 = vpop.f32.mrf.mxu3  ;;  %v1117_v38 = vpop.f32.mrf.mxu1 }
  0xe7   :  { %v1214_v39 = vadd.f32 %v1213_v37, %v1165_v36  ;;  %v1118_v41 = vadd.f32 %v1117_v38, %v2836_v56  ;;  %v2222_v56 = vld [vmem:[%s3290_s0 + $0xf4] sm:$0xf] }
  0xe8   :  { %v1264_v42 = vpop.f32.mrf.mxu0  ;;  %v1755_v60 = vor.u32 %v2222_v56, %v1752_v47  ;;  %v1816_v56 = vld [vmem:[%s3290_s0 + $0x19c] sm:$0xf0] }
  0xe9   :  { %v2966_v44 = vadd.f32 %v1262_v33, %v1214_v39  ;;  %v1795_v33 = vor.u32 %v2236_v25, %v1794_v24  ;;  %v2253_v24 = vld [vmem:[%s3290_s0 + $0x1e8] sm:$0xf0] }
  0xea   :  { %v2249_v25 = vld [vmem:[%s3290_s0 + $0x1cc] sm:$0xf] }
  0xec   :  { %v1166_v51 = vpop.f32.mrf.mxu2 }
  0xed   :  { %v1167_v52 = vadd.f32 %v1166_v51, %v1118_v41 }
  0xee   :  { %v1215_v53 = vpop.f32.mrf.mxu3  ;;  %v1120_v59 = vpop.f32.mrf.mxu1 }
  0xef   :  { %v1216_v63 = vadd.f32 %v1215_v53, %v1167_v52  ;;  %v1121_v0 = vadd.f32 %v1120_v59, %v2866_v6  ;;  %v1780_v6 = vld [vmem:[%s3290_s0 + $0x154] sm:$0xf0]  ;;  %v1824_v52 = vld [vmem:[%s3290_s0 + $0x1a4] sm:$0xf0] }
  0xf0   :  { %v1267_v1 = vpop.f32.mrf.mxu0  ;;  %v1783_v29 = vor.u32 %v2230_v13, %v1780_v6  ;;  %v1830_v53 = vld [vmem:[%s3290_s0 + $0x188] sm:$0xf] }
  0xf1   :  { %1315 = vmatmul.bf16.gmra.mxu1 %v1747_v57  ;;  %1364 = vmatmul.bf16.gmra.mxu2 %v1751_v58  ;;  %v2987_v4 = vadd.f32 %v1264_v42, %v1216_v63  ;;  %v2245_v57 = vld [vmem:[%s3290_s0 + $0x1a8] sm:$0xf0] }
  0xf3   :  { %1413 = vmatmul.bf16.gmra.mxu3 %v1755_v60  ;;  %1462 = vmatmul.bf16.gmra.mxu0 %v1759_v61  ;;  %v1819_v61 = vor.u32 %v2239_v46, %v1816_v56 }
  0xf4   :  { %v1169_v5 = vpop.f32.mrf.mxu2 }
  0xf5   :  { %v1170_v7 = vadd.f32 %v1169_v5, %v1121_v0 }
  0xf6   :  { %v1218_v8 = vpop.f32.mrf.mxu3  ;;  %v1122_v14 = vpop.f32.mrf.mxu1 }
  0xf7   :  { %v1219_v9 = vadd.f32 %v1218_v8, %v1170_v7  ;;  %v1123_v16 = vadd.f32 %v1122_v14, %v2872_v12  ;;  %v2231_v12 = vld [vmem:[%s3290_s0 + $0x13c] sm:$0xf] }
  0xf8   :  { %v1269_v17 = vpop.f32.mrf.mxu0  ;;  %v1791_v32 = vor.u32 %v2231_v12, %v1788_v21  ;;  %v1852_v12 = vld [vmem:[%s3290_s0 + $0x1e4] sm:$0xf0] }
  0xf9   :  { %v2996_v18 = vadd.f32 %v1267_v1, %v1219_v9  ;;  %v1827_v1 = vor.u32 %v2240_v49, %v1824_v52  ;;  %v2257_v49 = vld [vmem:[%s3290_s0 + $0x20c] sm:$0xf] }
  0xfc   :  { %v1171_v26 = vpop.f32.mrf.mxu2 }
  0xfd   :  { %v1172_v27 = vadd.f32 %v1171_v26, %v1123_v16 }
  0xfe   :  { %v1220_v28 = vpop.f32.mrf.mxu3  ;;  %v1125_v31 = vpop.f32.mrf.mxu1 }
  0xff   :  { %v1221_v35 = vadd.f32 %v1220_v28, %v1172_v27  ;;  %v1126_v38 = vadd.f32 %v1125_v31, %v2832_v54  ;;  %v1822_v54 = vld [vmem:[%s3290_s0 + $0x180] sm:$0xf]  ;;  %v1860_v27 = vld [vmem:[%s3290_s0 + $0x1ec] sm:$0xf0] }
 0x100   :  { %v1272_v36 = vpop.f32.mrf.mxu0  ;;  %v1823_v63 = vor.u32 %v2244_v48, %v1822_v54  ;;  %v1866_v28 = vld [vmem:[%s3290_s0 + $0x1d0] sm:$0xf] }
 0x101   :  { %1320 = vmatmul.bf16.gmra.mxu1 %v1783_v29  ;;  %1369 = vmatmul.bf16.gmra.mxu2 %v1787_v30  ;;  %v3016_v37 = vadd.f32 %v1269_v17, %v1221_v35  ;;  %v2254_v29 = vld [vmem:[%s3290_s0 + $0x1f0] sm:$0xf0] }
 0x103   :  { %1418 = vmatmul.bf16.gmra.mxu3 %v1791_v32  ;;  %1467 = vmatmul.bf16.gmra.mxu0 %v1795_v33  ;;  %v1855_v33 = vor.u32 %v2248_v20, %v1852_v12 }
 0x104   :  { %v1174_v39 = vpop.f32.mrf.mxu2 }
 0x105   :  { %v1175_v41 = vadd.f32 %v1174_v39, %v1126_v38  ;;  %v1863_v38 = vor.u32 %v2249_v25, %v1860_v27 }
 0x106   :  { %v1223_v42 = vpop.f32.mrf.mxu3  ;;  %v1127_v43 = vpop.f32.mrf.mxu1 }
 0x107   :  { %v1224_v50 = vadd.f32 %v1223_v42, %v1175_v41  ;;  %v1128_v51 = vadd.f32 %v1127_v43, %v2862_v2  ;;  %v1831_v2 = vor.u32 %v2245_v57, %v1830_v53  ;;  %v2262_v53 = vld [vmem:[%s3290_s0 + $0x230] sm:$0xf0] }
 0x108   :  { %v1274_v45 = vpop.f32.mrf.mxu0  ;;  %v2258_v57 = vld [vmem:[%s3290_s0 + $0x214] sm:$0xf] }
 0x109   :  { %v3025_v47 = vadd.f32 %v1272_v36, %v1224_v50 }
 0x10c   :  { %v1176_v58 = vpop.f32.mrf.mxu2 }
 0x10d   :  { %v1177_v59 = vadd.f32 %v1176_v58, %v1128_v51  ;;  %v1888_v51 = vld [vmem:[%s3290_s0 + $0x22c] sm:$0xf0] }
 0x10e   :  { %v1225_v60 = vpop.f32.mrf.mxu3  ;;  %v1130_v0 = vpop.f32.mrf.mxu1 }
 0x10f   :  { %v1226_v5 = vadd.f32 %v1225_v60, %v1177_v59  ;;  %v1131_v14 = vadd.f32 %v1130_v0, %v2868_v10  ;;  %v1858_v10 = vld [vmem:[%s3290_s0 + $0x1c8] sm:$0xf]  ;;  %v1896_v59 = vld [vmem:[%s3290_s0 + $0x234] sm:$0xf0] }
 0x110   :  { %v1277_v7 = vpop.f32.mrf.mxu0  ;;  %v1859_v35 = vor.u32 %v2253_v24, %v1858_v10  ;;  %v1902_v60 = vld [vmem:[%s3290_s0 + $0x218] sm:$0xf] }
 0x111   :  { %1325 = vmatmul.bf16.gmra.mxu1 %v1819_v61  ;;  %1374 = vmatmul.bf16.gmra.mxu2 %v1823_v63  ;;  %v3046_v8 = vadd.f32 %v1274_v45, %v1226_v5  ;;  %v2263_v61 = vld [vmem:[%s3290_s0 + $0x238] sm:$0xf0] }
 0x113   :  { %1423 = vmatmul.bf16.gmra.mxu3 %v1827_v1  ;;  %1472 = vmatmul.bf16.gmra.mxu0 %v1831_v2  ;;  %v1891_v2 = vor.u32 %v2257_v49, %v1888_v51 }
 0x114   :  { %v1179_v9 = vpop.f32.mrf.mxu2 }
 0x115   :  { %v1180_v16 = vadd.f32 %v1179_v9, %v1131_v14  ;;  %v1899_v14 = vor.u32 %v2258_v57, %v1896_v59 }
 0x116   :  { %v1228_v17 = vpop.f32.mrf.mxu3  ;;  %v1132_v13 = vpop.f32.mrf.mxu1 }
 0x117   :  { %v1229_v6 = vadd.f32 %v1228_v17, %v1180_v16  ;;  %v1133_v26 = vadd.f32 %v1132_v13, %v2898_v22  ;;  %v1867_v22 = vor.u32 %v2254_v29, %v1866_v28 }
 0x118   :  { %v1279_v19 = vpop.f32.mrf.mxu0 }
 0x119   :  { %v3055_v21 = vadd.f32 %v1277_v7, %v1229_v6 }
 0x11c   :  { %v1181_v30 = vpop.f32.mrf.mxu2 }
 0x11d   :  { %v1182_v31 = vadd.f32 %v1181_v30, %v1133_v26 }
 0x11e   :  { %v1230_v32 = vpop.f32.mrf.mxu3  ;;  %v1135_v36 = vpop.f32.mrf.mxu1 }
 0x11f   :  { %v1231_v39 = vadd.f32 %v1230_v32, %v1182_v31  ;;  %v1136_v43 = vadd.f32 %v1135_v36, %v2834_v55  ;;  %v1894_v55 = vld [vmem:[%s3290_s0 + $0x210] sm:$0xf] }
 0x120   :  { %v1282_v41 = vpop.f32.mrf.mxu0  ;;  %v1895_v5 = vor.u32 %v2262_v53, %v1894_v55 }
 0x121   :  { %1330 = vmatmul.bf16.gmra.mxu1 %v1855_v33  ;;  %1379 = vmatmul.bf16.gmra.mxu2 %v1859_v35  ;;  %v3076_v42 = vadd.f32 %v1279_v19, %v1231_v39 }
 0x123   :  { %1428 = vmatmul.bf16.gmra.mxu3 %v1863_v38  ;;  %1477 = vmatmul.bf16.gmra.mxu0 %v1867_v22 }
 0x124   :  { %v1184_v50 = vpop.f32.mrf.mxu2 }
 0x125   :  { %v1185_v45 = vadd.f32 %v1184_v50, %v1136_v43  ;;  %v3123_v50 = vld [vmem:[%s3292_s3] ss:$0 sm:$0xff] }
 0x126   :  { %v1233_v46 = vpop.f32.mrf.mxu3  ;;  %v1137_v56 = vpop.f32.mrf.mxu1 }
 0x127   :  { %v1234_v54 = vadd.f32 %v1233_v46, %v1185_v45  ;;  %v1138_v58 = vadd.f32 %v1137_v56, %v2864_v3  ;;  %v1903_v3 = vor.u32 %v2263_v61, %v1902_v60 }
 0x128   :  { %v1284_v48 = vpop.f32.mrf.mxu0 }
 0x129   :  { %v3085_v52 = vadd.f32 %v1282_v41, %v1234_v54  ;;  %v3118_v41 = vld [vmem:[%s3291_s2] ss:$0 sm:$0xff] }
 0x12a   :  { %v3131_v54 = vld [vmem:[%s3293_s5] ss:$0 sm:$0xff] }
 0x12c   :  { %v1186_v63 = vpop.f32.mrf.mxu2 }
 0x12d   :  { %v1187_v0 = vadd.f32 %v1186_v63, %v1138_v58  ;;  %v1528_v58 = vld [vmem:[%s3294_s4] sm:$0xff] }
 0x12e   :  { %v1235_v1 = vpop.f32.mrf.mxu3  ;;  %v1140_v7 = vpop.f32.mrf.mxu1 }
 0x12f   :  { %v1236_v9 = vadd.f32 %v1235_v1, %v1187_v0  ;;  %v1141_v13 = vadd.f32 %v1140_v7, %v2870_v11 }
 0x130   :  { %v1287_v16 = vpop.f32.mrf.mxu0 }
 0x131   :  { %1335 = vmatmul.bf16.gmra.mxu1 %v1891_v2  ;;  %1384 = vmatmul.bf16.gmra.mxu2 %v1895_v5  ;;  %v3106_v17 = vadd.f32 %v1284_v48, %v1236_v9 }
 0x133   :  { %1433 = vmatmul.bf16.gmra.mxu3 %v1899_v14  ;;  %1482 = vmatmul.bf16.gmra.mxu0 %v1903_v3 }
 0x134   :  { %v1189_v6 = vpop.f32.mrf.mxu2 }
 0x135   :  { %v1190_v19 = vadd.f32 %v1189_v6, %v1141_v13 }
 0x136   :  { %v1238_v20 = vpop.f32.mrf.mxu3  ;;  %v1142_v12 = vpop.f32.mrf.mxu1 }
 0x137   :  { %v1239_v10 = vadd.f32 %v1238_v20, %v1190_v19  ;;  %v1143_v26 = vadd.f32 %v1142_v12, %v2900_v23 }
 0x138   :  { %v1289_v24 = vpop.f32.mrf.mxu0 }
 0x139   :  { %v3109_v25 = vadd.f32 %v1287_v16, %v1239_v10  ;;  %v1529_v16 = vld [vmem:[%s3294_s4 + $0x8] sm:$0xff] }
 0x13c   :  { %v1191_v27 = vpop.f32.mrf.mxu2 }
 0x13d   :  { %v1192_v28 = vadd.f32 %v1191_v27, %v1143_v26 }
 0x13e   :  { %v1240_v29 = vpop.f32.mrf.mxu3  ;;  %v1301_v30 = vpop.f32.mrf.mxu1 }
 0x13f   :  { %v1241_v31 = vadd.f32 %v1240_v29, %v1192_v28  ;;  %v1302_v11 = vadd.f32 %v1301_v30, %v2908_v40 }
 0x140   :  { %v1448_v32 = vpop.f32.mrf.mxu0 }
 0x141   :  { %v3112_v33 = vadd.f32 %v1289_v24, %v1241_v31  ;;  %v1530_v31 = vld [vmem:[%s3294_s4 + $0x10] sm:$0xff] }
 0x144   :  { %v1350_v35 = vpop.f32.mrf.mxu2 }
 0x145   :  { %v1351_v36 = vadd.f32 %v1350_v35, %v1302_v11 }
 0x146   :  { %v1399_v38 = vpop.f32.mrf.mxu3  ;;  %v1303_v22 = vpop.f32.mrf.mxu1 }
 0x147   :  { %v1400_v39 = vadd.f32 %v1399_v38, %v1351_v36  ;;  %v1304_v40 = vadd.f32 %v1303_v22, %v2928_v62 }
 0x148   :  { %v1450_v23 = vpop.f32.mrf.mxu0 }
 0x149   :  { %v1449_v43 = vadd.f32 %v1448_v32, %v1400_v39 }
 0x14b   :  { %v1492_v45 = vmul.f32 %v3118_v41, %v1449_v43 }
 0x14c   :  { %v1352_v46 = vpop.f32.mrf.mxu2 }
 0x14d   :  { %v1512_v56 = vadd.f32 %v3123_v50, %v1492_v45  ;;  %v1353_v48 = vadd.f32 %v1352_v46, %v1304_v40 }
 0x14e   :  { %v1401_v49 = vpop.f32.mrf.mxu3  ;;  %v1306_v51 = vpop.f32.mrf.mxu1 }
 0x14f   :  { %v1545_v55 = vmax.f32 %v1512_v56, 0.0  ;;  %v1402_v53 = vadd.f32 %v1401_v49, %v1353_v48  ;;  %v1307_v63 = vadd.f32 %v1306_v51, %v2936_v15  ;;  %v1531_v56 = vld [vmem:[%s3294_s4 + $0x18] sm:$0xff] }
 0x150   :  { %v1453_v57 = vpop.f32.mrf.mxu0 }
 0x151   :  { %v1564_v62 = vmul.f32 %v3131_v54, %v1545_v55  ;;  %v1451_v59 = vadd.f32 %v1450_v23, %v1402_v53 }
 0x153   :  { %v1580_v60 = vadd.f32 %v1564_v62, %v1528_v58  ;;  %v1493_v61 = vmul.f32 %v3118_v41, %v1451_v59 }
 0x154   :  { %v1355_v0 = vpop.f32.mrf.mxu2 }
 0x155   :  { %1596 = vst [vmem:[%s3295_s6] sm:$0xff] %v1580_v60  ;;  %v1513_v1 = vadd.f32 %v3123_v50, %v1493_v61  ;;  %v1356_v2 = vadd.f32 %v1355_v0, %v1307_v63  ;;  %v1532_v0 = vld [vmem:[%s3294_s4 + $0x20] sm:$0xff] }
 0x156   :  { %v1404_v5 = vpop.f32.mrf.mxu3  ;;  %v1308_v7 = vpop.f32.mrf.mxu1 }
 0x157   :  { %v1546_v14 = vmax.f32 %v1513_v1, 0.0  ;;  %v1405_v3 = vadd.f32 %v1404_v5, %v1356_v2  ;;  %v1309_v20 = vadd.f32 %v1308_v7, %v2957_v34 }
 0x158   :  { %v1455_v9 = vpop.f32.mrf.mxu0 }
 0x159   :  { %v1565_v13 = vmul.f32 %v3131_v54, %v1546_v14  ;;  %v1454_v15 = vadd.f32 %v1453_v57, %v1405_v3 }
 0x15b   :  { %v1581_v6 = vadd.f32 %v1565_v13, %v1529_v16  ;;  %v1494_v19 = vmul.f32 %v3118_v41, %v1454_v15 }
 0x15c   :  { %v1357_v12 = vpop.f32.mrf.mxu2 }
 0x15d   :  { %1597 = vst [vmem:[%s3295_s6 + $0x8] sm:$0xff] %v1581_v6  ;;  %v1514_v10 = vadd.f32 %v3123_v50, %v1494_v19  ;;  %v1358_v24 = vadd.f32 %v1357_v12, %v1309_v20  ;;  %v1533_v20 = vld [vmem:[%s3294_s4 + $0x28] sm:$0xff] }
 0x15e   :  { %v1406_v26 = vpop.f32.mrf.mxu3  ;;  %v1311_v27 = vpop.f32.mrf.mxu1 }
 0x15f   :  { %v1547_v28 = vmax.f32 %v1514_v10, 0.0  ;;  %v1407_v29 = vadd.f32 %v1406_v26, %v1358_v24  ;;  %v1312_v36 = vadd.f32 %v1311_v27, %v2966_v44 }
 0x160   :  { %v1458_v30 = vpop.f32.mrf.mxu0 }
 0x161   :  { %v1566_v32 = vmul.f32 %v3131_v54, %v1547_v28  ;;  %v1456_v34 = vadd.f32 %v1455_v9, %v1407_v29 }
 0x163   :  { %v1582_v11 = vadd.f32 %v1566_v32, %v1530_v31  ;;  %v1495_v35 = vmul.f32 %v3118_v41, %v1456_v34 }
 0x164   :  { %v1360_v38 = vpop.f32.mrf.mxu2 }
 0x165   :  { %1598 = vst [vmem:[%s3295_s6 + $0x10] sm:$0xff] %v1582_v11  ;;  %v1515_v22 = vadd.f32 %v3123_v50, %v1495_v35  ;;  %v1361_v39 = vadd.f32 %v1360_v38, %v1312_v36  ;;  %v1534_v35 = vld [vmem:[%s3294_s4 + $0x30] sm:$0xff] }
 0x166   :  { %v1409_v23 = vpop.f32.mrf.mxu3  ;;  %v1313_v43 = vpop.f32.mrf.mxu1 }
 0x167   :  { %v1548_v45 = vmax.f32 %v1515_v22, 0.0  ;;  %v1410_v40 = vadd.f32 %v1409_v23, %v1361_v39  ;;  %v1314_v55 = vadd.f32 %v1313_v43, %v2987_v4 }
 0x168   :  { %v1460_v46 = vpop.f32.mrf.mxu0 }
 0x169   :  { %v1567_v48 = vmul.f32 %v3131_v54, %v1548_v45  ;;  %v1459_v44 = vadd.f32 %v1458_v30, %v1410_v40 }
 0x16b   :  { %v1583_v49 = vadd.f32 %v1567_v48, %v1531_v56  ;;  %v1496_v51 = vmul.f32 %v3118_v41, %v1459_v44 }
 0x16c   :  { %v1362_v53 = vpop.f32.mrf.mxu2 }
 0x16d   :  { %1599 = vst [vmem:[%s3295_s6 + $0x18] sm:$0xff] %v1583_v49  ;;  %v1516_v57 = vadd.f32 %v3123_v50, %v1496_v51  ;;  %v1363_v58 = vadd.f32 %v1362_v53, %v1314_v55  ;;  %v1535_v49 = vld [vmem:[%s3294_s4 + $0x38] sm:$0xff] }
 0x16e   :  { %v1411_v62 = vpop.f32.mrf.mxu3  ;;  %v1316_v59 = vpop.f32.mrf.mxu1 }
 0x16f   :  { %v1549_v60 = vmax.f32 %v1516_v57, 0.0  ;;  %v1412_v61 = vadd.f32 %v1411_v62, %v1363_v58  ;;  %v1317_v7 = vadd.f32 %v1316_v59, %v2996_v18 }
 0x170   :  { %v1463_v63 = vpop.f32.mrf.mxu0 }
 0x171   :  { %v1568_v1 = vmul.f32 %v3131_v54, %v1549_v60  ;;  %v1461_v4 = vadd.f32 %v1460_v46, %v1412_v61 }
 0x173   :  { %v1584_v2 = vadd.f32 %v1568_v1, %v1532_v0  ;;  %v1497_v5 = vmul.f32 %v3118_v41, %v1461_v4  ;;  %v1536_v4 = vld [vmem:[%s3294_s4 + $0x40] sm:$0xff] }
 0x174   :  { %v1365_v14 = vpop.f32.mrf.mxu2 }
 0x175   :  { %1600 = vst [vmem:[%s3295_s6 + $0x20] sm:$0xff] %v1584_v2  ;;  %v1517_v3 = vadd.f32 %v3123_v50, %v1497_v5  ;;  %v1366_v9 = vadd.f32 %v1365_v14, %v1317_v7 }
 0x176   :  { %v1414_v16 = vpop.f32.mrf.mxu3  ;;  %v1318_v13 = vpop.f32.mrf.mxu1 }
 0x177   :  { %v1550_v15 = vmax.f32 %v1517_v3, 0.0  ;;  %v1415_v6 = vadd.f32 %v1414_v16, %v1366_v9  ;;  %v1319_v26 = vadd.f32 %v1318_v13, %v3016_v37 }
 0x178   :  { %v1465_v19 = vpop.f32.mrf.mxu0 }
 0x179   :  { %v1569_v12 = vmul.f32 %v3131_v54, %v1550_v15  ;;  %v1464_v18 = vadd.f32 %v1463_v63, %v1415_v6 }
 0x17b   :  { %v1585_v10 = vadd.f32 %v1569_v12, %v1533_v20  ;;  %v1498_v24 = vmul.f32 %v3118_v41, %v1464_v18  ;;  %v1537_v20 = vld [vmem:[%s3294_s4 + $0x48] sm:$0xff] }
 0x17c   :  { %v1367_v27 = vpop.f32.mrf.mxu2 }
 0x17d   :  { %1601 = vst [vmem:[%s3295_s6 + $0x28] sm:$0xff] %v1585_v10  ;;  %v1518_v28 = vadd.f32 %v3123_v50, %v1498_v24  ;;  %v1368_v29 = vadd.f32 %v1367_v27, %v1319_v26 }
 0x17e   :  { %v1416_v30 = vpop.f32.mrf.mxu3  ;;  %v1321_v31 = vpop.f32.mrf.mxu1 }
 0x17f   :  { %v1551_v32 = vmax.f32 %v1518_v28, 0.0  ;;  %v1417_v34 = vadd.f32 %v1416_v30, %v1368_v29  ;;  %v1322_v39 = vadd.f32 %v1321_v31, %v3025_v47 }
 0x180   :  { %v1468_v11 = vpop.f32.mrf.mxu0 }
 0x181   :  { %v1570_v36 = vmul.f32 %v3131_v54, %v1551_v32  ;;  %v1466_v37 = vadd.f32 %v1465_v19, %v1417_v34 }
 0x183   :  { %v1586_v38 = vadd.f32 %v1570_v36, %v1534_v35  ;;  %v1499_v22 = vmul.f32 %v3118_v41, %v1466_v37 }
 0x184   :  { %v1370_v23 = vpop.f32.mrf.mxu2 }
 0x185   :  { %1602 = vst [vmem:[%s3295_s6 + $0x30] sm:$0xff] %v1586_v38  ;;  %v1519_v43 = vadd.f32 %v3123_v50, %v1499_v22  ;;  %v1371_v45 = vadd.f32 %v1370_v23, %v1322_v39 }
 0x186   :  { %v1419_v40 = vpop.f32.mrf.mxu3  ;;  %v1323_v46 = vpop.f32.mrf.mxu1 }
 0x187   :  { %v1552_v56 = vmax.f32 %v1519_v43, 0.0  ;;  %v1420_v48 = vadd.f32 %v1419_v40, %v1371_v45  ;;  %v1324_v57 = vadd.f32 %v1323_v46, %v3046_v8 }
 0x188   :  { %v1470_v44 = vpop.f32.mrf.mxu0 }
 0x189   :  { %v1571_v51 = vmul.f32 %v3131_v54, %v1552_v56  ;;  %v1469_v47 = vadd.f32 %v1468_v11, %v1420_v48  ;;  %v1538_v11 = vld [vmem:[%s3294_s4 + $0x50] sm:$0xff]  ;;  %v1539_v48 = vld [vmem:[%s3294_s4 + $0x58] sm:$0xff] }
 0x18b   :  { %v1587_v55 = vadd.f32 %v1571_v51, %v1535_v49  ;;  %v1500_v53 = vmul.f32 %v3118_v41, %v1469_v47 }
 0x18c   :  { %v1372_v58 = vpop.f32.mrf.mxu2 }
 0x18d   :  { %1603 = vst [vmem:[%s3295_s6 + $0x38] sm:$0xff] %v1587_v55  ;;  %v1520_v62 = vadd.f32 %v3123_v50, %v1500_v53  ;;  %v1373_v59 = vadd.f32 %v1372_v58, %v1324_v57 }
 0x18e   :  { %v1421_v60 = vpop.f32.mrf.mxu3  ;;  %v1326_v61 = vpop.f32.mrf.mxu1 }
 0x18f   :  { %v1553_v63 = vmax.f32 %v1520_v62, 0.0  ;;  %v1422_v0 = vadd.f32 %v1421_v60, %v1373_v59  ;;  %v1327_v14 = vadd.f32 %v1326_v61, %v3055_v21 }
 0x190   :  { %v1473_v1 = vpop.f32.mrf.mxu0 }
 0x191   :  { %v1572_v2 = vmul.f32 %v3131_v54, %v1553_v63  ;;  %v1471_v8 = vadd.f32 %v1470_v44, %v1422_v0  ;;  %v1540_v63 = vld [vmem:[%s3294_s4 + $0x60] sm:$0xff] }
 0x193   :  { %v1588_v5 = vadd.f32 %v1572_v2, %v1536_v4  ;;  %v1501_v7 = vmul.f32 %v3118_v41, %v1471_v8 }
 0x194   :  { %v1375_v3 = vpop.f32.mrf.mxu2 }
 0x195   :  { %1604 = vst [vmem:[%s3295_s6 + $0x40] sm:$0xff] %v1588_v5  ;;  %v1521_v9 = vadd.f32 %v3123_v50, %v1501_v7  ;;  %v1376_v16 = vadd.f32 %v1375_v3, %v1327_v14 }
 0x196   :  { %v1424_v13 = vpop.f32.mrf.mxu3  ;;  %v1328_v15 = vpop.f32.mrf.mxu1 }
 0x197   :  { %v1554_v6 = vmax.f32 %v1521_v9, 0.0  ;;  %v1425_v19 = vadd.f32 %v1424_v13, %v1376_v16  ;;  %v1329_v26 = vadd.f32 %v1328_v15, %v3076_v42  ;;  %v1541_v13 = vld [vmem:[%s3294_s4 + $0x68] sm:$0xff] }
 0x198   :  { %v1475_v12 = vpop.f32.mrf.mxu0 }
 0x199   :  { %v1573_v18 = vmul.f32 %v3131_v54, %v1554_v6  ;;  %v1474_v21 = vadd.f32 %v1473_v1, %v1425_v19 }
 0x19b   :  { %v1589_v10 = vadd.f32 %v1573_v18, %v1537_v20  ;;  %v1502_v24 = vmul.f32 %v3118_v41, %v1474_v21 }
 0x19c   :  { %v1377_v27 = vpop.f32.mrf.mxu2 }
 0x19d   :  { %1605 = vst [vmem:[%s3295_s6 + $0x48] sm:$0xff] %v1589_v10  ;;  %v1522_v28 = vadd.f32 %v3123_v50, %v1502_v24  ;;  %v1378_v29 = vadd.f32 %v1377_v27, %v1329_v26 }
 0x19e   :  { %v1426_v30 = vpop.f32.mrf.mxu3  ;;  %v1331_v31 = vpop.f32.mrf.mxu1 }
 0x19f   :  { %v1555_v32 = vmax.f32 %v1522_v28, 0.0  ;;  %v1427_v34 = vadd.f32 %v1426_v30, %v1378_v29  ;;  %v1332_v22 = vadd.f32 %v1331_v31, %v3085_v52  ;;  %v1542_v28 = vld [vmem:[%s3294_s4 + $0x70] sm:$0xff] }
 0x1a0   :  { %v1478_v42 = vpop.f32.mrf.mxu0 }
 0x1a1   :  { %v1574_v35 = vmul.f32 %v3131_v54, %v1555_v32  ;;  %v1476_v36 = vadd.f32 %v1475_v12, %v1427_v34 }
 0x1a3   :  { %v1590_v37 = vadd.f32 %v1574_v35, %v1538_v11  ;;  %v1503_v38 = vmul.f32 %v3118_v41, %v1476_v36  ;;  %v1543_v35 = vld [vmem:[%s3294_s4 + $0x78] sm:$0xff] }
 0x1a4   :  { %v1380_v39 = vpop.f32.mrf.mxu2 }
 0x1a5   :  { %1606 = vst [vmem:[%s3295_s6 + $0x50] sm:$0xff] %v1590_v37  ;;  %v1523_v23 = vadd.f32 %v3123_v50, %v1503_v38  ;;  %v1381_v43 = vadd.f32 %v1380_v39, %v1332_v22 }
 0x1a6   :  { %v1429_v45 = vpop.f32.mrf.mxu3  ;;  %v1333_v40 = vpop.f32.mrf.mxu1 }
 0x1a7   :  { %v1556_v46 = vmax.f32 %v1523_v23, 0.0  ;;  %v1430_v56 = vadd.f32 %v1429_v45, %v1381_v43  ;;  %v1334_v47 = vadd.f32 %v1333_v40, %v3106_v17 }
 0x1a8   :  { %v1480_v55 = vpop.f32.mrf.mxu0 }
 0x1a9   :  { %v1575_v44 = vmul.f32 %v3131_v54, %v1556_v46  ;;  %v1479_v49 = vadd.f32 %v1478_v42, %v1430_v56 }
 0x1ab   :  { %v1591_v52 = vadd.f32 %v1575_v44, %v1539_v48  ;;  %v1504_v51 = vmul.f32 %v3118_v41, %v1479_v49 }
 0x1ac   :  { %v1382_v53 = vpop.f32.mrf.mxu2 }
 0x1ad   :  { %1607 = vst [vmem:[%s3295_s6 + $0x58] sm:$0xff] %v1591_v52  ;;  %v1524_v57 = vadd.f32 %v3123_v50, %v1504_v51  ;;  %v1383_v58 = vadd.f32 %v1382_v53, %v1334_v47 }
 0x1ae   :  { %v1431_v62 = vpop.f32.mrf.mxu3  ;;  %v1336_v59 = vpop.f32.mrf.mxu1 }
 0x1af   :  { %v1557_v60 = vmax.f32 %v1524_v57, 0.0  ;;  %v1432_v61 = vadd.f32 %v1431_v62, %v1383_v58  ;;  %v1337_v2 = vadd.f32 %v1336_v59, %v3109_v25 }
 0x1b0   :  { %v1483_v3 = vpop.f32.mrf.mxu0 }
 0x1b1   :  { %v1576_v0 = vmul.f32 %v3131_v54, %v1557_v60  ;;  %v1481_v17 = vadd.f32 %v1480_v55, %v1432_v61 }
 0x1b3   :  { %v1592_v1 = vadd.f32 %v1576_v0, %v1540_v63  ;;  %v1505_v4 = vmul.f32 %v3118_v41, %v1481_v17 }
 0x1b4   :  { %v1385_v8 = vpop.f32.mrf.mxu2 }
 0x1b5   :  { %1608 = vst [vmem:[%s3295_s6 + $0x60] sm:$0xff] %v1592_v1  ;;  %v1525_v5 = vadd.f32 %v3123_v50, %v1505_v4  ;;  %v1386_v7 = vadd.f32 %v1385_v8, %v1337_v2 }
 0x1b6   :  { %v1434_v14 = vpop.f32.mrf.mxu3  ;;  %v1338_v15 = vpop.f32.mrf.mxu1 }
 0x1b7   :  { %v1558_v9 = vmax.f32 %v1525_v5, 0.0  ;;  %v1435_v16 = vadd.f32 %v1434_v14, %v1386_v7  ;;  %v1339_v12 = vadd.f32 %v1338_v15, %v3112_v33 }
 0x1b8   :  { %v1485_v29 = vpop.f32.mrf.mxu0 }
 0x1b9   :  { %v1577_v6 = vmul.f32 %v3131_v54, %v1558_v9  ;;  %v1484_v25 = vadd.f32 %v1483_v3, %v1435_v16 }
 0x1bb   :  { %v1593_v19 = vadd.f32 %v1577_v6, %v1541_v13  ;;  %v1506_v20 = vmul.f32 %v3118_v41, %v1484_v25 }
 0x1bc   :  { %v1387_v18 = vpop.f32.mrf.mxu2 }
 0x1bd   :  { %1609 = vst [vmem:[%s3295_s6 + $0x68] sm:$0xff] %v1593_v19  ;;  %v1526_v21 = vadd.f32 %v3123_v50, %v1506_v20  ;;  %v1388_v10 = vadd.f32 %v1387_v18, %v1339_v12 }
 0x1be   :  { %v1436_v24 = vpop.f32.mrf.mxu3 }
 0x1bf   :  { %v1559_v26 = vmax.f32 %v1526_v21, 0.0  ;;  %v1437_v27 = vadd.f32 %v1436_v24, %v1388_v10 }
 0x1c1   :  { %v1578_v30 = vmul.f32 %v3131_v54, %v1559_v26  ;;  %v1486_v31 = vadd.f32 %v1485_v29, %v1437_v27 }
 0x1c3   :  { %v1594_v33 = vadd.f32 %v1578_v30, %v1542_v28  ;;  %v1507_v32 = vmul.f32 %v3118_v41, %v1486_v31 }
 0x1c5   :  { %1610 = vst [vmem:[%s3295_s6 + $0x70] sm:$0xff] %v1594_v33  ;;  %v1527_v34 = vadd.f32 %v3123_v50, %v1507_v32 }
 0x1c7   :  { %v1560_v11 = vmax.f32 %v1527_v34, 0.0 }
 0x1c9   :  { %v1579_v36 = vmul.f32 %v3131_v54, %v1560_v11 }
 0x1cb   :  { %v1595_v42 = vadd.f32 %v1579_v36, %v1543_v35 }
 0x1cd   :  { %1611 = vst [vmem:[%s3295_s6 + $0x78] sm:$0xff] %v1595_v42 }

</bundles_post_ra>
